<compile_context>
chip_gen: v7x
topology: tpu7x:2x2x1
jax: 0.10.0
libtpu: 0.0.40
codegen_flags: <defaults>
</compile_context>

<pallas_src>
import functools

import jax
import jax.numpy as jnp
from jax.experimental import pallas as pl
from jax.experimental.pallas import tpu as pltpu

EPS = 1e-5
LANE = 128
CIN_PAD = 8  # raw RGB channels padded 3 -> 8 for the stem


def _rup(c, m=LANE):
    return ((c + m - 1) // m) * m


# ------------------------------- kernels -------------------------------------


def _stem_kernel(x_ref, w_ref, b_ref, o_ref, rowbuf_ref, obuf_ref, *, H, W, Ho, Wo):
    """Custom_Conv(3, C, k=3, stride=2, pad=0) + folded BN + ReLU, one image.

    x_ref: (1, H, W, Cip) f32   w_ref: (9, Cip, Cop) f32 (BN scale folded)
    b_ref: (1, Cop) f32         o_ref: (1, Ho*Wo, Cop) bf16
    rowbuf_ref: VMEM (W-2, Cop) f32 (full-res conv row)
    obuf_ref:   VMEM (Ho*Wo, Cop) f32
    """
    Wf = W - 2  # full-resolution (stride-1, VALID) output width
    cop = o_ref.shape[-1]
    for oh in range(Ho):
        acc = jnp.zeros((Wf, cop), jnp.float32)
        for kh in range(3):
            r = 2 * oh + kh
            for kw in range(3):
                tap = x_ref[0, r, pl.ds(kw, Wf), :]                 # (Wf, Cip)
                acc = acc + jnp.dot(tap, w_ref[3 * kh + kw],
                                    preferred_element_type=jnp.float32)
        rowbuf_ref[...] = acc
        sub = rowbuf_ref[pl.ds(0, Wo, stride=2), :]                 # stride-2 cols
        obuf_ref[pl.ds(oh * Wo, Wo), :] = jnp.maximum(sub + b_ref[...], 0.0)
    o_ref[0] = obuf_ref[...].astype(o_ref.dtype)


def _bottleneck_kernel(x_ref, w1_ref, b1_ref, wd_ref, bd_ref, w2_ref, b2_ref,
                       o_ref, h2_ref, hid_ref, dw_ref,
                       *, H, W, stride, use_shortcut):
    """Fused LinearBottleneck for one image.

    x_ref : (1, H*W, Cpi) bf16
    w1_ref: (Cpi, Cph) bf16      b1_ref: (1, Cph) f32
    wd_ref: (9, Cph)  f32        bd_ref: (1, Cph) f32
    w2_ref: (Cph, Cpo) bf16      b2_ref: (1, Cpo) f32
    o_ref : (1, Ho*Wo, Cpo) bf16
    h2_ref : VMEM (H*W, Cph) f32            -- 1x1 expand output
    hid_ref: VMEM ((H+2)*(W+2), Cph) f32    -- zero-padded hidden image (flattened)
    dw_ref : VMEM (Ho*Wo, Cph) f32          -- depthwise output
    """
    Ho = (H - 1) // stride + 1
    Wo = (W - 1) // stride + 1
    Wp = W + 2
    cph = hid_ref.shape[-1]

    # ---- 1x1 expand (BN scale pre-folded into w1) + shift + ReLU ------------
    h = jnp.dot(x_ref[0], w1_ref[...], preferred_element_type=jnp.float32)
    h2_ref[...] = jnp.maximum(h + b1_ref[...], 0.0)

    # ---- scatter rows into a zero-padded VMEM image (no HBM pad round trip) -
    hid_ref[...] = jnp.zeros_like(hid_ref)
    for hi in range(H):
        hid_ref[pl.ds((hi + 1) * Wp + 1, W), :] = h2_ref[pl.ds(hi * W, W), :]

    # ---- depthwise 3x3, pad=1, stride in {1,2}, + shift + ReLU --------------
    # Computed directly at the strided output resolution; stride-2 taps use
    # strided VMEM reads (no XLA phase transpose).
    for oh in range(Ho):
        acc = jnp.zeros((Wo, cph), jnp.float32)
        for kh in range(3):
            base = (stride * oh + kh) * Wp
            for kw in range(3):
                if stride == 1:
                    tap = hid_ref[pl.ds(base + kw, Wo), :]
                else:
                    tap = hid_ref[pl.ds(base + kw, Wo, stride=stride), :]
                acc = acc + tap * wd_ref[3 * kh + kw]
        row = jnp.maximum(acc + bd_ref[...], 0.0)
        dw_ref[pl.ds(oh * Wo, Wo), :] = row

    # ---- 1x1 project (no ReLU) [+ fused residual] ---------------------------
    y = jnp.dot(dw_ref[...].astype(jnp.bfloat16), w2_ref[...],
                preferred_element_type=jnp.float32)
    y = y + b2_ref[...]
    if use_shortcut:
        y = y + x_ref[0].astype(jnp.float32)
    o_ref[0] = y.astype(o_ref.dtype)


# ---------------------------- kernel wrappers ---------------------------------


def stem_forward(x, w, b):
    """x: (N, H, W, Cip) f32  ->  (N, Ho, Wo, Cop) bf16."""
    N, H, W, Cip = x.shape
    Ho = (H - 3) // 2 + 1
    Wo = (W - 3) // 2 + 1
    Cop = w.shape[-1]
    kernel = functools.partial(_stem_kernel, H=H, W=W, Ho=Ho, Wo=Wo)
    out = pl.pallas_call(
        kernel,
        out_shape=jax.ShapeDtypeStruct((N, Ho * Wo, Cop), jnp.bfloat16),
        grid=(N,),
        in_specs=[
            pl.BlockSpec((1, H, W, Cip), lambda n: (n, 0, 0, 0)),
            pl.BlockSpec((9, Cip, Cop), lambda n: (0, 0, 0)),
            pl.BlockSpec((1, Cop), lambda n: (0, 0)),
        ],
        out_specs=pl.BlockSpec((1, Ho * Wo, Cop), lambda n: (n, 0, 0)),
        scratch_shapes=[
            pltpu.VMEM((W - 2, Cop), jnp.float32),
            pltpu.VMEM((Ho * Wo, Cop), jnp.float32),
        ],
        compiler_params=pltpu.CompilerParams(dimension_semantics=("parallel",)),
    )(x, w, b)
    return out.reshape(N, Ho, Wo, Cop)


def bottleneck_forward(x, blk):
    """x: (N, H, W, Cpi) bf16  ->  (N, Ho, Wo, Cpo) bf16 (whole block fused)."""
    N, H, W, Cpi = x.shape
    stride = blk['stride']
    Ho = (H - 1) // stride + 1
    Wo = (W - 1) // stride + 1
    Cph = blk['w1'].shape[1]
    Cpo = blk['w2'].shape[1]
    kernel = functools.partial(_bottleneck_kernel, H=H, W=W, stride=stride,
                               use_shortcut=blk['use_shortcut'])
    x2 = x.reshape(N, H * W, Cpi)        # free reshape (contiguous dims)
    out = pl.pallas_call(
        kernel,
        out_shape=jax.ShapeDtypeStruct((N, Ho * Wo, Cpo), jnp.bfloat16),
        grid=(N,),
        in_specs=[
            pl.BlockSpec((1, H * W, Cpi), lambda n: (n, 0, 0)),
            pl.BlockSpec((Cpi, Cph), lambda n: (0, 0)),
            pl.BlockSpec((1, Cph), lambda n: (0, 0)),
            pl.BlockSpec((9, Cph), lambda n: (0, 0)),
            pl.BlockSpec((1, Cph), lambda n: (0, 0)),
            pl.BlockSpec((Cph, Cpo), lambda n: (0, 0)),
            pl.BlockSpec((1, Cpo), lambda n: (0, 0)),
        ],
        out_specs=pl.BlockSpec((1, Ho * Wo, Cpo), lambda n: (n, 0, 0)),
        scratch_shapes=[
            pltpu.VMEM((H * W, Cph), jnp.float32),
            pltpu.VMEM(((H + 2) * (W + 2), Cph), jnp.float32),
            pltpu.VMEM((Ho * Wo, Cph), jnp.float32),
        ],
        compiler_params=pltpu.CompilerParams(dimension_semantics=("parallel",)),
    )(x2, blk['w1'], blk['b1'], blk['wd'], blk['bd'], blk['w2'], blk['b2'])
    return out.reshape(N, Ho, Wo, Cpo)


def deep_net_forward(x_nchw, params):
    x = jnp.transpose(x_nchw, (0, 2, 3, 1))                 # NCHW -> NHWC
    N, H, W, C = x.shape
    x = jnp.pad(x, ((0, 0), (0, 0), (0, 0), (0, params['cip'] - C)))
    x = stem_forward(x, params['stem_w'], params['stem_b'])  # bf16 from here on
    for stage in params['stages']:
        for blk in stage:
            x = bottleneck_forward(x, blk)
    c_out = params['c_out']
    return jnp.transpose(x[..., :c_out].astype(jnp.float32), (0, 3, 1, 2))


# ----------------------------- parameter build --------------------------------


def _bn_fold(key, c):
    k1, k2, k3, k4 = jax.random.split(key, 4)
    gamma = jax.random.uniform(k1, (c,), jnp.float32, 0.5, 1.5)
    beta = jax.random.normal(k2, (c,), jnp.float32) * 0.1
    mean = jax.random.normal(k3, (c,), jnp.float32) * 0.1
    var = jax.random.uniform(k4, (c,), jnp.float32, 0.5, 1.5)
    scale = gamma / jnp.sqrt(var + EPS)
    shift = beta - mean * scale
    return scale, shift


def _pad_shift(shift, cp):
    return jnp.zeros((1, cp), jnp.float32).at[0, :shift.shape[0]].set(shift)


def make_bottleneck_params(key, cin, cout, t, stride):
    k1, k2, k3, kb1, kb2, kb3 = jax.random.split(key, 6)
    hidden = cin * t
    cpi, cph, cpo = _rup(cin), _rup(hidden), _rup(cout)
    w1 = jax.random.normal(k1, (cin, hidden), jnp.float32) * 0.1
    wd = jax.random.normal(k2, (3, 3, hidden), jnp.float32) * 0.1
    w2 = jax.random.normal(k3, (hidden, cout), jnp.float32) * 0.1
    s1, b1 = _bn_fold(kb1, hidden)
    sd, bd = _bn_fold(kb2, hidden)
    s2, b2 = _bn_fold(kb3, cout)
    # BN scale folded into the weights; lane-padded regions are exactly zero.
    w1f = jnp.zeros((cpi, cph), jnp.float32).at[:cin, :hidden].set(w1 * s1[None, :])
    wdf = jnp.zeros((9, cph), jnp.float32).at[:, :hidden].set(
        (wd * sd[None, None, :]).reshape(9, hidden))
    w2f = jnp.zeros((cph, cpo), jnp.float32).at[:hidden, :cout].set(w2 * s2[None, :])
    return dict(
        cin=cin, hidden=hidden, cout=cout, stride=stride,
        use_shortcut=(stride == 1 and cin == cout),
        w1=w1f.astype(jnp.bfloat16), w2=w2f.astype(jnp.bfloat16), wd=wdf,
        b1=_pad_shift(b1, cph), bd=_pad_shift(bd, cph), b2=_pad_shift(b2, cpo),
        w1_f32=w1f, w2_f32=w2f,   # for the pure-JAX reference
    )


def build_deep_net_params(key, in_channels, block_channels, t, num_blocks):
    strides = [1, 1, 2, 2, 1, 1]                       # per Deep_net.__init__
    key, kw_, kb_ = jax.random.split(key, 3)
    cip = CIN_PAD
    cpo = _rup(in_channels)
    stem_w = jax.random.normal(kw_, (3, 3, 3, in_channels), jnp.float32) * 0.1
    s0, b0 = _bn_fold(kb_, in_channels)
    stem_wf = jnp.zeros((9, cip, cpo), jnp.float32).at[:, :3, :in_channels].set(
        (stem_w * s0[None, None, None, :]).reshape(9, 3, in_channels))
    params = {
        'c_in': in_channels, 'c_out': block_channels[-1], 'cip': cip,
        'stem_w': stem_wf, 'stem_b': _pad_shift(b0, cpo),
    }
    stages = []
    cin = in_channels
    for si in range(6):
        cout = block_channels[si]
        blocks = []
        for bi in range(num_blocks[si]):
            stride = strides[si] if bi == 0 else 1
            key, kb = jax.random.split(key)
            blocks.append(make_bottleneck_params(kb, cin, cout, t[si], stride))
            cin = cout
        stages.append(blocks)
    params['stages'] = stages
    return params


# ----------------------------- pure-JAX reference ------------------------------


def _ref_conv(x, w, stride, padding):
    return jax.lax.conv_general_dilated(
        x, w, (stride, stride), padding,
        dimension_numbers=('NHWC', 'HWIO', 'NHWC'))


def ref_forward(x_nchw, params):
    x = jnp.transpose(x_nchw, (0, 2, 3, 1))
    cin = params['c_in']
    w = params['stem_w'][:, :3, :cin].reshape(3, 3, 3, cin)
    x = jnp.maximum(_ref_conv(x, w, 2, 'VALID') + params['stem_b'][0, :cin], 0.0)
    for stage in params['stages']:
        for blk in stage:
            ci, hid, co = blk['cin'], blk['hidden'], blk['cout']
            inp = x
            h = jnp.maximum(
                _ref_conv(x, blk['w1_f32'][:ci, :hid].reshape(1, 1, ci, hid),
                          1, 'VALID') + blk['b1'][0, :hid], 0.0)
            wd = blk['wd'][:, :hid].reshape(3, 3, 1, hid)
            h = jnp.maximum(
                jax.lax.conv_general_dilated(
                    h, wd, (blk['stride'],) * 2, [(1, 1), (1, 1)],
                    dimension_numbers=('NHWC', 'HWIO', 'NHWC'),
                    feature_group_count=hid) + blk['bd'][0, :hid], 0.0)
            h = (_ref_conv(h, blk['w2_f32'][:hid, :co].reshape(1, 1, hid, co),
                           1, 'VALID') + blk['b2'][0, :co])
            x = inp + h if blk['use_shortcut'] else h
    return jnp.transpose(x, (0, 3, 1, 2))


# ----------------------------------- main --------------------------------------

if __name__ == "__main__":
    key = jax.random.PRNGKey(0)
    kx, kp = jax.random.split(key)

    # Small synthetic Deep_net configuration.
    in_channels = 8
    block_channels = [8, 12, 16, 16, 24, 24]
    t = [1, 2, 2, 2, 2, 2]
    num_blocks = [1, 1, 1, 1, 1, 1]

    # PyTorch-style NCHW input.
    x = jax.random.normal(kx, (2, 3, 16, 16), jnp.float32)
    params = build_deep_net_params(kp, in_channels, block_channels, t, num_blocks)

    out = jax.block_until_ready(deep_net_forward(x, params))
    assert out.shape == (2, block_channels[-1], 2, 2), out.shape

    ref = jax.block_until_ready(ref_forward(x, params))
    max_err = float(jnp.max(jnp.abs(out - ref)))
    # Tolerance accounts for bf16 activation/weight storage vs. the f32 reference.
    assert jnp.allclose(out, ref, rtol=5e-2, atol=5e-2), max_err

    print("KERNEL_OK")
</pallas_src>

<mosaic_0001>
module attributes {stable_mosaic.version = 11 : i64} {
  func.func @_stem_kernel(%arg0: i32, %arg1: memref<1x16x16x8xf32, #tpu.memory_space<vmem>>, %arg2: memref<9x8x128xf32, #tpu.memory_space<vmem>>, %arg3: memref<1x128xf32, #tpu.memory_space<vmem>>, %arg4: memref<1x49x128xbf16, #tpu.memory_space<vmem>>, %arg5: memref<14x128xf32, #tpu.memory_space<vmem>>, %arg6: memref<49x128xf32, #tpu.memory_space<vmem>>) attributes {dimension_semantics = [#tpu.dimension_semantics<parallel>], iteration_bounds = array<i64: 2>, scalar_prefetch = 0 : i64, scratch_operands = 2 : i64, tpu.core_type = #tpu.core_type<tc>, window_params = [{transform_indices = @transform_0, window_bounds = array<i64: 1, 16, 16, 8>}, {pipeline_mode = #tpu.pipeline_mode<synchronous>, transform_indices = @transform_1, window_bounds = array<i64: 9, 8, 128>}, {pipeline_mode = #tpu.pipeline_mode<synchronous>, transform_indices = @transform_2, window_bounds = array<i64: 1, 128>}, {transform_indices = @transform_3, window_bounds = array<i64: 1, 49, 128>}]} {
    %cst = arith.constant 0.000000e+00 : f32
    %0 = vector.broadcast %cst : f32 to vector<14x128xf32>
    %c0 = arith.constant 0 : index
    %c0_0 = arith.constant 0 : index
    %c0_1 = arith.constant 0 : index
    %c0_2 = arith.constant 0 : index
    %1 = vector.load %arg1[%c0, %c0_0, %c0_1, %c0_2] : memref<1x16x16x8xf32, #tpu.memory_space<vmem>>, vector<1x1x14x8xf32>
    %2 = vector.shape_cast %1 : vector<1x1x14x8xf32> to vector<14x8xf32>
    %c0_3 = arith.constant 0 : index
    %c0_4 = arith.constant 0 : index
    %c0_5 = arith.constant 0 : index
    %3 = vector.load %arg2[%c0_3, %c0_4, %c0_5] : memref<9x8x128xf32, #tpu.memory_space<vmem>>, vector<1x8x128xf32>
    %4 = vector.shape_cast %3 : vector<1x8x128xf32> to vector<8x128xf32>
    %cst_6 = arith.constant dense<0.000000e+00> : vector<14x128xf32>
    %5 = tpu.matmul %2, %4, %cst_6 {dimension_numbers = #tpu.dot_dimension_numbers<[1], [0], [0], [1], [0, 0, 1, 1], [], []>} : vector<14x8xf32>, vector<8x128xf32>, vector<14x128xf32> -> vector<14x128xf32>
    %6 = arith.addf %0, %5 : vector<14x128xf32>
    %c0_7 = arith.constant 0 : index
    %c0_8 = arith.constant 0 : index
    %c1 = arith.constant 1 : index
    %c0_9 = arith.constant 0 : index
    %7 = vector.load %arg1[%c0_7, %c0_8, %c1, %c0_9] : memref<1x16x16x8xf32, #tpu.memory_space<vmem>>, vector<1x1x14x8xf32>
    %8 = vector.shape_cast %7 : vector<1x1x14x8xf32> to vector<14x8xf32>
    %c1_10 = arith.constant 1 : index
    %c0_11 = arith.constant 0 : index
    %c0_12 = arith.constant 0 : index
    %9 = vector.load %arg2[%c1_10, %c0_11, %c0_12] : memref<9x8x128xf32, #tpu.memory_space<vmem>>, vector<1x8x128xf32>
    %10 = vector.shape_cast %9 : vector<1x8x128xf32> to vector<8x128xf32>
    %cst_13 = arith.constant dense<0.000000e+00> : vector<14x128xf32>
    %11 = tpu.matmul %8, %10, %cst_13 {dimension_numbers = #tpu.dot_dimension_numbers<[1], [0], [0], [1], [0, 0, 1, 1], [], []>} : vector<14x8xf32>, vector<8x128xf32>, vector<14x128xf32> -> vector<14x128xf32>
    %12 = arith.addf %6, %11 : vector<14x128xf32>
    %c0_14 = arith.constant 0 : index
    %c0_15 = arith.constant 0 : index
    %c2 = arith.constant 2 : index
    %c0_16 = arith.constant 0 : index
    %13 = vector.load %arg1[%c0_14, %c0_15, %c2, %c0_16] : memref<1x16x16x8xf32, #tpu.memory_space<vmem>>, vector<1x1x14x8xf32>
    %14 = vector.shape_cast %13 : vector<1x1x14x8xf32> to vector<14x8xf32>
    %c2_17 = arith.constant 2 : index
    %c0_18 = arith.constant 0 : index
    %c0_19 = arith.constant 0 : index
    %15 = vector.load %arg2[%c2_17, %c0_18, %c0_19] : memref<9x8x128xf32, #tpu.memory_space<vmem>>, vector<1x8x128xf32>
    %16 = vector.shape_cast %15 : vector<1x8x128xf32> to vector<8x128xf32>
    %cst_20 = arith.constant dense<0.000000e+00> : vector<14x128xf32>
    %17 = tpu.matmul %14, %16, %cst_20 {dimension_numbers = #tpu.dot_dimension_numbers<[1], [0], [0], [1], [0, 0, 1, 1], [], []>} : vector<14x8xf32>, vector<8x128xf32>, vector<14x128xf32> -> vector<14x128xf32>
    %18 = arith.addf %12, %17 : vector<14x128xf32>
    %c0_21 = arith.constant 0 : index
    %c1_22 = arith.constant 1 : index
    %c0_23 = arith.constant 0 : index
    %c0_24 = arith.constant 0 : index
    %19 = vector.load %arg1[%c0_21, %c1_22, %c0_23, %c0_24] : memref<1x16x16x8xf32, #tpu.memory_space<vmem>>, vector<1x1x14x8xf32>
    %20 = vector.shape_cast %19 : vector<1x1x14x8xf32> to vector<14x8xf32>
    %c3 = arith.constant 3 : index
    %c0_25 = arith.constant 0 : index
    %c0_26 = arith.constant 0 : index
    %21 = vector.load %arg2[%c3, %c0_25, %c0_26] : memref<9x8x128xf32, #tpu.memory_space<vmem>>, vector<1x8x128xf32>
    %22 = vector.shape_cast %21 : vector<1x8x128xf32> to vector<8x128xf32>
    %cst_27 = arith.constant dense<0.000000e+00> : vector<14x128xf32>
    %23 = tpu.matmul %20, %22, %cst_27 {dimension_numbers = #tpu.dot_dimension_numbers<[1], [0], [0], [1], [0, 0, 1, 1], [], []>} : vector<14x8xf32>, vector<8x128xf32>, vector<14x128xf32> -> vector<14x128xf32>
    %24 = arith.addf %18, %23 : vector<14x128xf32>
    %c0_28 = arith.constant 0 : index
    %c1_29 = arith.constant 1 : index
    %c1_30 = arith.constant 1 : index
    %c0_31 = arith.constant 0 : index
    %25 = vector.load %arg1[%c0_28, %c1_29, %c1_30, %c0_31] : memref<1x16x16x8xf32, #tpu.memory_space<vmem>>, vector<1x1x14x8xf32>
    %26 = vector.shape_cast %25 : vector<1x1x14x8xf32> to vector<14x8xf32>
    %c4 = arith.constant 4 : index
    %c0_32 = arith.constant 0 : index
    %c0_33 = arith.constant 0 : index
    %27 = vector.load %arg2[%c4, %c0_32, %c0_33] : memref<9x8x128xf32, #tpu.memory_space<vmem>>, vector<1x8x128xf32>
    %28 = vector.shape_cast %27 : vector<1x8x128xf32> to vector<8x128xf32>
    %cst_34 = arith.constant dense<0.000000e+00> : vector<14x128xf32>
    %29 = tpu.matmul %26, %28, %cst_34 {dimension_numbers = #tpu.dot_dimension_numbers<[1], [0], [0], [1], [0, 0, 1, 1], [], []>} : vector<14x8xf32>, vector<8x128xf32>, vector<14x128xf32> -> vector<14x128xf32>
    %30 = arith.addf %24, %29 : vector<14x128xf32>
    %c0_35 = arith.constant 0 : index
    %c1_36 = arith.constant 1 : index
    %c2_37 = arith.constant 2 : index
    %c0_38 = arith.constant 0 : index
    %31 = vector.load %arg1[%c0_35, %c1_36, %c2_37, %c0_38] : memref<1x16x16x8xf32, #tpu.memory_space<vmem>>, vector<1x1x14x8xf32>
    %32 = vector.shape_cast %31 : vector<1x1x14x8xf32> to vector<14x8xf32>
    %c5 = arith.constant 5 : index
    %c0_39 = arith.constant 0 : index
    %c0_40 = arith.constant 0 : index
    %33 = vector.load %arg2[%c5, %c0_39, %c0_40] : memref<9x8x128xf32, #tpu.memory_space<vmem>>, vector<1x8x128xf32>
    %34 = vector.shape_cast %33 : vector<1x8x128xf32> to vector<8x128xf32>
    %cst_41 = arith.constant dense<0.000000e+00> : vector<14x128xf32>
    %35 = tpu.matmul %32, %34, %cst_41 {dimension_numbers = #tpu.dot_dimension_numbers<[1], [0], [0], [1], [0, 0, 1, 1], [], []>} : vector<14x8xf32>, vector<8x128xf32>, vector<14x128xf32> -> vector<14x128xf32>
    %36 = arith.addf %30, %35 : vector<14x128xf32>
    %c0_42 = arith.constant 0 : index
    %c2_43 = arith.constant 2 : index
    %c0_44 = arith.constant 0 : index
    %c0_45 = arith.constant 0 : index
    %37 = vector.load %arg1[%c0_42, %c2_43, %c0_44, %c0_45] : memref<1x16x16x8xf32, #tpu.memory_space<vmem>>, vector<1x1x14x8xf32>
    %38 = vector.shape_cast %37 : vector<1x1x14x8xf32> to vector<14x8xf32>
    %c6 = arith.constant 6 : index
    %c0_46 = arith.constant 0 : index
    %c0_47 = arith.constant 0 : index
    %39 = vector.load %arg2[%c6, %c0_46, %c0_47] : memref<9x8x128xf32, #tpu.memory_space<vmem>>, vector<1x8x128xf32>
    %40 = vector.shape_cast %39 : vector<1x8x128xf32> to vector<8x128xf32>
    %cst_48 = arith.constant dense<0.000000e+00> : vector<14x128xf32>
    %41 = tpu.matmul %38, %40, %cst_48 {dimension_numbers = #tpu.dot_dimension_numbers<[1], [0], [0], [1], [0, 0, 1, 1], [], []>} : vector<14x8xf32>, vector<8x128xf32>, vector<14x128xf32> -> vector<14x128xf32>
    %42 = arith.addf %36, %41 : vector<14x128xf32>
    %c0_49 = arith.constant 0 : index
    %c2_50 = arith.constant 2 : index
    %c1_51 = arith.constant 1 : index
    %c0_52 = arith.constant 0 : index
    %43 = vector.load %arg1[%c0_49, %c2_50, %c1_51, %c0_52] : memref<1x16x16x8xf32, #tpu.memory_space<vmem>>, vector<1x1x14x8xf32>
    %44 = vector.shape_cast %43 : vector<1x1x14x8xf32> to vector<14x8xf32>
    %c7 = arith.constant 7 : index
    %c0_53 = arith.constant 0 : index
    %c0_54 = arith.constant 0 : index
    %45 = vector.load %arg2[%c7, %c0_53, %c0_54] : memref<9x8x128xf32, #tpu.memory_space<vmem>>, vector<1x8x128xf32>
    %46 = vector.shape_cast %45 : vector<1x8x128xf32> to vector<8x128xf32>
    %cst_55 = arith.constant dense<0.000000e+00> : vector<14x128xf32>
    %47 = tpu.matmul %44, %46, %cst_55 {dimension_numbers = #tpu.dot_dimension_numbers<[1], [0], [0], [1], [0, 0, 1, 1], [], []>} : vector<14x8xf32>, vector<8x128xf32>, vector<14x128xf32> -> vector<14x128xf32>
    %48 = arith.addf %42, %47 : vector<14x128xf32>
    %c0_56 = arith.constant 0 : index
    %c2_57 = arith.constant 2 : index
    %c2_58 = arith.constant 2 : index
    %c0_59 = arith.constant 0 : index
    %49 = vector.load %arg1[%c0_56, %c2_57, %c2_58, %c0_59] : memref<1x16x16x8xf32, #tpu.memory_space<vmem>>, vector<1x1x14x8xf32>
    %50 = vector.shape_cast %49 : vector<1x1x14x8xf32> to vector<14x8xf32>
    %c8 = arith.constant 8 : index
    %c0_60 = arith.constant 0 : index
    %c0_61 = arith.constant 0 : index
    %51 = vector.load %arg2[%c8, %c0_60, %c0_61] : memref<9x8x128xf32, #tpu.memory_space<vmem>>, vector<1x8x128xf32>
    %52 = vector.shape_cast %51 : vector<1x8x128xf32> to vector<8x128xf32>
    %cst_62 = arith.constant dense<0.000000e+00> : vector<14x128xf32>
    %53 = tpu.matmul %50, %52, %cst_62 {dimension_numbers = #tpu.dot_dimension_numbers<[1], [0], [0], [1], [0, 0, 1, 1], [], []>} : vector<14x8xf32>, vector<8x128xf32>, vector<14x128xf32> -> vector<14x128xf32>
    %54 = arith.addf %48, %53 : vector<14x128xf32>
    %c0_63 = arith.constant 0 : index
    %c0_64 = arith.constant 0 : index
    %55 = vector.load %arg5[%c0_63, %c0_64] : memref<14x128xf32, #tpu.memory_space<vmem>>, vector<14x128xf32>
    tpu.vector_store %arg5[%c0_63, %c0_64], %54 {strides = array<i32>} : memref<14x128xf32, #tpu.memory_space<vmem>>, vector<14x128xf32>,
    %c0_65 = arith.constant 0 : index
    %c0_66 = arith.constant 0 : index
    %56 = tpu.strided_load %arg5[%c0_65, %c0_66] {strides = array<i32: 2, 1>} : memref<14x128xf32, #tpu.memory_space<vmem>>, vector<7x128xf32>
    %c0_67 = arith.constant 0 : index
    %c0_68 = arith.constant 0 : index
    %57 = vector.load %arg3[%c0_67, %c0_68] : memref<1x128xf32, #tpu.memory_space<vmem>>, vector<1x128xf32>
    %58 = vector.broadcast %57 : vector<1x128xf32> to vector<7x128xf32>
    %59 = arith.addf %56, %58 : vector<7x128xf32>
    %cst_69 = arith.constant 0.000000e+00 : f32
    %60 = vector.broadcast %cst_69 : f32 to vector<7x128xf32>
    %61 = arith.maximumf %59, %60 : vector<7x128xf32>
    %c0_70 = arith.constant 0 : index
    %c0_71 = arith.constant 0 : index
    %62 = vector.load %arg6[%c0_70, %c0_71] : memref<49x128xf32, #tpu.memory_space<vmem>>, vector<7x128xf32>
    tpu.vector_store %arg6[%c0_70, %c0_71], %61 {strides = array<i32>} : memref<49x128xf32, #tpu.memory_space<vmem>>, vector<7x128xf32>,
    %cst_72 = arith.constant 0.000000e+00 : f32
    %63 = vector.broadcast %cst_72 : f32 to vector<14x128xf32>
    %c0_73 = arith.constant 0 : index
    %c2_74 = arith.constant 2 : index
    %c0_75 = arith.constant 0 : index
    %c0_76 = arith.constant 0 : index
    %64 = vector.load %arg1[%c0_73, %c2_74, %c0_75, %c0_76] : memref<1x16x16x8xf32, #tpu.memory_space<vmem>>, vector<1x1x14x8xf32>
    %65 = vector.shape_cast %64 : vector<1x1x14x8xf32> to vector<14x8xf32>
    %c0_77 = arith.constant 0 : index
    %c0_78 = arith.constant 0 : index
    %c0_79 = arith.constant 0 : index
    %66 = vector.load %arg2[%c0_77, %c0_78, %c0_79] : memref<9x8x128xf32, #tpu.memory_space<vmem>>, vector<1x8x128xf32>
    %67 = vector.shape_cast %66 : vector<1x8x128xf32> to vector<8x128xf32>
    %cst_80 = arith.constant dense<0.000000e+00> : vector<14x128xf32>
    %68 = tpu.matmul %65, %67, %cst_80 {dimension_numbers = #tpu.dot_dimension_numbers<[1], [0], [0], [1], [0, 0, 1, 1], [], []>} : vector<14x8xf32>, vector<8x128xf32>, vector<14x128xf32> -> vector<14x128xf32>
    %69 = arith.addf %63, %68 : vector<14x128xf32>
    %c0_81 = arith.constant 0 : index
    %c2_82 = arith.constant 2 : index
    %c1_83 = arith.constant 1 : index
    %c0_84 = arith.constant 0 : index
    %70 = vector.load %arg1[%c0_81, %c2_82, %c1_83, %c0_84] : memref<1x16x16x8xf32, #tpu.memory_space<vmem>>, vector<1x1x14x8xf32>
    %71 = vector.shape_cast %70 : vector<1x1x14x8xf32> to vector<14x8xf32>
    %c1_85 = arith.constant 1 : index
    %c0_86 = arith.constant 0 : index
    %c0_87 = arith.constant 0 : index
    %72 = vector.load %arg2[%c1_85, %c0_86, %c0_87] : memref<9x8x128xf32, #tpu.memory_space<vmem>>, vector<1x8x128xf32>
    %73 = vector.shape_cast %72 : vector<1x8x128xf32> to vector<8x128xf32>
    %cst_88 = arith.constant dense<0.000000e+00> : vector<14x128xf32>
    %74 = tpu.matmul %71, %73, %cst_88 {dimension_numbers = #tpu.dot_dimension_numbers<[1], [0], [0], [1], [0, 0, 1, 1], [], []>} : vector<14x8xf32>, vector<8x128xf32>, vector<14x128xf32> -> vector<14x128xf32>
    %75 = arith.addf %69, %74 : vector<14x128xf32>
    %c0_89 = arith.constant 0 : index
    %c2_90 = arith.constant 2 : index
    %c2_91 = arith.constant 2 : index
    %c0_92 = arith.constant 0 : index
    %76 = vector.load %arg1[%c0_89, %c2_90, %c2_91, %c0_92] : memref<1x16x16x8xf32, #tpu.memory_space<vmem>>, vector<1x1x14x8xf32>
    %77 = vector.shape_cast %76 : vector<1x1x14x8xf32> to vector<14x8xf32>
    %c2_93 = arith.constant 2 : index
    %c0_94 = arith.constant 0 : index
    %c0_95 = arith.constant 0 : index
    %78 = vector.load %arg2[%c2_93, %c0_94, %c0_95] : memref<9x8x128xf32, #tpu.memory_space<vmem>>, vector<1x8x128xf32>
    %79 = vector.shape_cast %78 : vector<1x8x128xf32> to vector<8x128xf32>
    %cst_96 = arith.constant dense<0.000000e+00> : vector<14x128xf32>
    %80 = tpu.matmul %77, %79, %cst_96 {dimension_numbers = #tpu.dot_dimension_numbers<[1], [0], [0], [1], [0, 0, 1, 1], [], []>} : vector<14x8xf32>, vector<8x128xf32>, vector<14x128xf32> -> vector<14x128xf32>
    %81 = arith.addf %75, %80 : vector<14x128xf32>
    %c0_97 = arith.constant 0 : index
    %c3_98 = arith.constant 3 : index
    %c0_99 = arith.constant 0 : index
    %c0_100 = arith.constant 0 : index
    %82 = vector.load %arg1[%c0_97, %c3_98, %c0_99, %c0_100] : memref<1x16x16x8xf32, #tpu.memory_space<vmem>>, vector<1x1x14x8xf32>
    %83 = vector.shape_cast %82 : vector<1x1x14x8xf32> to vector<14x8xf32>
    %c3_101 = arith.constant 3 : index
    %c0_102 = arith.constant 0 : index
    %c0_103 = arith.constant 0 : index
    %84 = vector.load %arg2[%c3_101, %c0_102, %c0_103] : memref<9x8x128xf32, #tpu.memory_space<vmem>>, vector<1x8x128xf32>
    %85 = vector.shape_cast %84 : vector<1x8x128xf32> to vector<8x128xf32>
    %cst_104 = arith.constant dense<0.000000e+00> : vector<14x128xf32>
    %86 = tpu.matmul %83, %85, %cst_104 {dimension_numbers = #tpu.dot_dimension_numbers<[1], [0], [0], [1], [0, 0, 1, 1], [], []>} : vector<14x8xf32>, vector<8x128xf32>, vector<14x128xf32> -> vector<14x128xf32>
    %87 = arith.addf %81, %86 : vector<14x128xf32>
    %c0_105 = arith.constant 0 : index
    %c3_106 = arith.constant 3 : index
    %c1_107 = arith.constant 1 : index
    %c0_108 = arith.constant 0 : index
    %88 = vector.load %arg1[%c0_105, %c3_106, %c1_107, %c0_108] : memref<1x16x16x8xf32, #tpu.memory_space<vmem>>, vector<1x1x14x8xf32>
    %89 = vector.shape_cast %88 : vector<1x1x14x8xf32> to vector<14x8xf32>
    %c4_109 = arith.constant 4 : index
    %c0_110 = arith.constant 0 : index
    %c0_111 = arith.constant 0 : index
    %90 = vector.load %arg2[%c4_109, %c0_110, %c0_111] : memref<9x8x128xf32, #tpu.memory_space<vmem>>, vector<1x8x128xf32>
    %91 = vector.shape_cast %90 : vector<1x8x128xf32> to vector<8x128xf32>
    %cst_112 = arith.constant dense<0.000000e+00> : vector<14x128xf32>
    %92 = tpu.matmul %89, %91, %cst_112 {dimension_numbers = #tpu.dot_dimension_numbers<[1], [0], [0], [1], [0, 0, 1, 1], [], []>} : vector<14x8xf32>, vector<8x128xf32>, vector<14x128xf32> -> vector<14x128xf32>
    %93 = arith.addf %87, %92 : vector<14x128xf32>
    %c0_113 = arith.constant 0 : index
    %c3_114 = arith.constant 3 : index
    %c2_115 = arith.constant 2 : index
    %c0_116 = arith.constant 0 : index
    %94 = vector.load %arg1[%c0_113, %c3_114, %c2_115, %c0_116] : memref<1x16x16x8xf32, #tpu.memory_space<vmem>>, vector<1x1x14x8xf32>
    %95 = vector.shape_cast %94 : vector<1x1x14x8xf32> to vector<14x8xf32>
    %c5_117 = arith.constant 5 : index
    %c0_118 = arith.constant 0 : index
    %c0_119 = arith.constant 0 : index
    %96 = vector.load %arg2[%c5_117, %c0_118, %c0_119] : memref<9x8x128xf32, #tpu.memory_space<vmem>>, vector<1x8x128xf32>
    %97 = vector.shape_cast %96 : vector<1x8x128xf32> to vector<8x128xf32>
    %cst_120 = arith.constant dense<0.000000e+00> : vector<14x128xf32>
    %98 = tpu.matmul %95, %97, %cst_120 {dimension_numbers = #tpu.dot_dimension_numbers<[1], [0], [0], [1], [0, 0, 1, 1], [], []>} : vector<14x8xf32>, vector<8x128xf32>, vector<14x128xf32> -> vector<14x128xf32>
    %99 = arith.addf %93, %98 : vector<14x128xf32>
    %c0_121 = arith.constant 0 : index
    %c4_122 = arith.constant 4 : index
    %c0_123 = arith.constant 0 : index
    %c0_124 = arith.constant 0 : index
    %100 = vector.load %arg1[%c0_121, %c4_122, %c0_123, %c0_124] : memref<1x16x16x8xf32, #tpu.memory_space<vmem>>, vector<1x1x14x8xf32>
    %101 = vector.shape_cast %100 : vector<1x1x14x8xf32> to vector<14x8xf32>
    %c6_125 = arith.constant 6 : index
    %c0_126 = arith.constant 0 : index
    %c0_127 = arith.constant 0 : index
    %102 = vector.load %arg2[%c6_125, %c0_126, %c0_127] : memref<9x8x128xf32, #tpu.memory_space<vmem>>, vector<1x8x128xf32>
    %103 = vector.shape_cast %102 : vector<1x8x128xf32> to vector<8x128xf32>
    %cst_128 = arith.constant dense<0.000000e+00> : vector<14x128xf32>
    %104 = tpu.matmul %101, %103, %cst_128 {dimension_numbers = #tpu.dot_dimension_numbers<[1], [0], [0], [1], [0, 0, 1, 1], [], []>} : vector<14x8xf32>, vector<8x128xf32>, vector<14x128xf32> -> vector<14x128xf32>
    %105 = arith.addf %99, %104 : vector<14x128xf32>
    %c0_129 = arith.constant 0 : index
    %c4_130 = arith.constant 4 : index
    %c1_131 = arith.constant 1 : index
    %c0_132 = arith.constant 0 : index
    %106 = vector.load %arg1[%c0_129, %c4_130, %c1_131, %c0_132] : memref<1x16x16x8xf32, #tpu.memory_space<vmem>>, vector<1x1x14x8xf32>
    %107 = vector.shape_cast %106 : vector<1x1x14x8xf32> to vector<14x8xf32>
    %c7_133 = arith.constant 7 : index
    %c0_134 = arith.constant 0 : index
    %c0_135 = arith.constant 0 : index
    %108 = vector.load %arg2[%c7_133, %c0_134, %c0_135] : memref<9x8x128xf32, #tpu.memory_space<vmem>>, vector<1x8x128xf32>
    %109 = vector.shape_cast %108 : vector<1x8x128xf32> to vector<8x128xf32>
    %cst_136 = arith.constant dense<0.000000e+00> : vector<14x128xf32>
    %110 = tpu.matmul %107, %109, %cst_136 {dimension_numbers = #tpu.dot_dimension_numbers<[1], [0], [0], [1], [0, 0, 1, 1], [], []>} : vector<14x8xf32>, vector<8x128xf32>, vector<14x128xf32> -> vector<14x128xf32>
    %111 = arith.addf %105, %110 : vector<14x128xf32>
    %c0_137 = arith.constant 0 : index
    %c4_138 = arith.constant 4 : index
    %c2_139 = arith.constant 2 : index
    %c0_140 = arith.constant 0 : index
    %112 = vector.load %arg1[%c0_137, %c4_138, %c2_139, %c0_140] : memref<1x16x16x8xf32, #tpu.memory_space<vmem>>, vector<1x1x14x8xf32>
    %113 = vector.shape_cast %112 : vector<1x1x14x8xf32> to vector<14x8xf32>
    %c8_141 = arith.constant 8 : index
    %c0_142 = arith.constant 0 : index
    %c0_143 = arith.constant 0 : index
    %114 = vector.load %arg2[%c8_141, %c0_142, %c0_143] : memref<9x8x128xf32, #tpu.memory_space<vmem>>, vector<1x8x128xf32>
    %115 = vector.shape_cast %114 : vector<1x8x128xf32> to vector<8x128xf32>
    %cst_144 = arith.constant dense<0.000000e+00> : vector<14x128xf32>
    %116 = tpu.matmul %113, %115, %cst_144 {dimension_numbers = #tpu.dot_dimension_numbers<[1], [0], [0], [1], [0, 0, 1, 1], [], []>} : vector<14x8xf32>, vector<8x128xf32>, vector<14x128xf32> -> vector<14x128xf32>
    %117 = arith.addf %111, %116 : vector<14x128xf32>
    %c0_145 = arith.constant 0 : index
    %c0_146 = arith.constant 0 : index
    %118 = vector.load %arg5[%c0_145, %c0_146] : memref<14x128xf32, #tpu.memory_space<vmem>>, vector<14x128xf32>
    tpu.vector_store %arg5[%c0_145, %c0_146], %117 {strides = array<i32>} : memref<14x128xf32, #tpu.memory_space<vmem>>, vector<14x128xf32>,
    %c0_147 = arith.constant 0 : index
    %c0_148 = arith.constant 0 : index
    %119 = tpu.strided_load %arg5[%c0_147, %c0_148] {strides = array<i32: 2, 1>} : memref<14x128xf32, #tpu.memory_space<vmem>>, vector<7x128xf32>
    %c0_149 = arith.constant 0 : index
    %c0_150 = arith.constant 0 : index
    %120 = vector.load %arg3[%c0_149, %c0_150] : memref<1x128xf32, #tpu.memory_space<vmem>>, vector<1x128xf32>
    %121 = vector.broadcast %120 : vector<1x128xf32> to vector<7x128xf32>
    %122 = arith.addf %119, %121 : vector<7x128xf32>
    %cst_151 = arith.constant 0.000000e+00 : f32
    %123 = vector.broadcast %cst_151 : f32 to vector<7x128xf32>
    %124 = arith.maximumf %122, %123 : vector<7x128xf32>
    %c7_152 = arith.constant 7 : index
    %c0_153 = arith.constant 0 : index
    %125 = vector.load %arg6[%c7_152, %c0_153] : memref<49x128xf32, #tpu.memory_space<vmem>>, vector<7x128xf32>
    tpu.vector_store %arg6[%c7_152, %c0_153], %124 {strides = array<i32>} : memref<49x128xf32, #tpu.memory_space<vmem>>, vector<7x128xf32>,
    %cst_154 = arith.constant 0.000000e+00 : f32
    %126 = vector.broadcast %cst_154 : f32 to vector<14x128xf32>
    %c0_155 = arith.constant 0 : index
    %c4_156 = arith.constant 4 : index
    %c0_157 = arith.constant 0 : index
    %c0_158 = arith.constant 0 : index
    %127 = vector.load %arg1[%c0_155, %c4_156, %c0_157, %c0_158] : memref<1x16x16x8xf32, #tpu.memory_space<vmem>>, vector<1x1x14x8xf32>
    %128 = vector.shape_cast %127 : vector<1x1x14x8xf32> to vector<14x8xf32>
    %c0_159 = arith.constant 0 : index
    %c0_160 = arith.constant 0 : index
    %c0_161 = arith.constant 0 : index
    %129 = vector.load %arg2[%c0_159, %c0_160, %c0_161] : memref<9x8x128xf32, #tpu.memory_space<vmem>>, vector<1x8x128xf32>
    %130 = vector.shape_cast %129 : vector<1x8x128xf32> to vector<8x128xf32>
    %cst_162 = arith.constant dense<0.000000e+00> : vector<14x128xf32>
    %131 = tpu.matmul %128, %130, %cst_162 {dimension_numbers = #tpu.dot_dimension_numbers<[1], [0], [0], [1], [0, 0, 1, 1], [], []>} : vector<14x8xf32>, vector<8x128xf32>, vector<14x128xf32> -> vector<14x128xf32>
    %132 = arith.addf %126, %131 : vector<14x128xf32>
    %c0_163 = arith.constant 0 : index
    %c4_164 = arith.constant 4 : index
    %c1_165 = arith.constant 1 : index
    %c0_166 = arith.constant 0 : index
    %133 = vector.load %arg1[%c0_163, %c4_164, %c1_165, %c0_166] : memref<1x16x16x8xf32, #tpu.memory_space<vmem>>, vector<1x1x14x8xf32>
    %134 = vector.shape_cast %133 : vector<1x1x14x8xf32> to vector<14x8xf32>
    %c1_167 = arith.constant 1 : index
    %c0_168 = arith.constant 0 : index
    %c0_169 = arith.constant 0 : index
    %135 = vector.load %arg2[%c1_167, %c0_168, %c0_169] : memref<9x8x128xf32, #tpu.memory_space<vmem>>, vector<1x8x128xf32>
    %136 = vector.shape_cast %135 : vector<1x8x128xf32> to vector<8x128xf32>
    %cst_170 = arith.constant dense<0.000000e+00> : vector<14x128xf32>
    %137 = tpu.matmul %134, %136, %cst_170 {dimension_numbers = #tpu.dot_dimension_numbers<[1], [0], [0], [1], [0, 0, 1, 1], [], []>} : vector<14x8xf32>, vector<8x128xf32>, vector<14x128xf32> -> vector<14x128xf32>
    %138 = arith.addf %132, %137 : vector<14x128xf32>
    %c0_171 = arith.constant 0 : index
    %c4_172 = arith.constant 4 : index
    %c2_173 = arith.constant 2 : index
    %c0_174 = arith.constant 0 : index
    %139 = vector.load %arg1[%c0_171, %c4_172, %c2_173, %c0_174] : memref<1x16x16x8xf32, #tpu.memory_space<vmem>>, vector<1x1x14x8xf32>
    %140 = vector.shape_cast %139 : vector<1x1x14x8xf32> to vector<14x8xf32>
    %c2_175 = arith.constant 2 : index
    %c0_176 = arith.constant 0 : index
    %c0_177 = arith.constant 0 : index
    %141 = vector.load %arg2[%c2_175, %c0_176, %c0_177] : memref<9x8x128xf32, #tpu.memory_space<vmem>>, vector<1x8x128xf32>
    %142 = vector.shape_cast %141 : vector<1x8x128xf32> to vector<8x128xf32>
    %cst_178 = arith.constant dense<0.000000e+00> : vector<14x128xf32>
    %143 = tpu.matmul %140, %142, %cst_178 {dimension_numbers = #tpu.dot_dimension_numbers<[1], [0], [0], [1], [0, 0, 1, 1], [], []>} : vector<14x8xf32>, vector<8x128xf32>, vector<14x128xf32> -> vector<14x128xf32>
    %144 = arith.addf %138, %143 : vector<14x128xf32>
    %c0_179 = arith.constant 0 : index
    %c5_180 = arith.constant 5 : index
    %c0_181 = arith.constant 0 : index
    %c0_182 = arith.constant 0 : index
    %145 = vector.load %arg1[%c0_179, %c5_180, %c0_181, %c0_182] : memref<1x16x16x8xf32, #tpu.memory_space<vmem>>, vector<1x1x14x8xf32>
    %146 = vector.shape_cast %145 : vector<1x1x14x8xf32> to vector<14x8xf32>
    %c3_183 = arith.constant 3 : index
    %c0_184 = arith.constant 0 : index
    %c0_185 = arith.constant 0 : index
    %147 = vector.load %arg2[%c3_183, %c0_184, %c0_185] : memref<9x8x128xf32, #tpu.memory_space<vmem>>, vector<1x8x128xf32>
    %148 = vector.shape_cast %147 : vector<1x8x128xf32> to vector<8x128xf32>
    %cst_186 = arith.constant dense<0.000000e+00> : vector<14x128xf32>
    %149 = tpu.matmul %146, %148, %cst_186 {dimension_numbers = #tpu.dot_dimension_numbers<[1], [0], [0], [1], [0, 0, 1, 1], [], []>} : vector<14x8xf32>, vector<8x128xf32>, vector<14x128xf32> -> vector<14x128xf32>
    %150 = arith.addf %144, %149 : vector<14x128xf32>
    %c0_187 = arith.constant 0 : index
    %c5_188 = arith.constant 5 : index
    %c1_189 = arith.constant 1 : index
    %c0_190 = arith.constant 0 : index
    %151 = vector.load %arg1[%c0_187, %c5_188, %c1_189, %c0_190] : memref<1x16x16x8xf32, #tpu.memory_space<vmem>>, vector<1x1x14x8xf32>
    %152 = vector.shape_cast %151 : vector<1x1x14x8xf32> to vector<14x8xf32>
    %c4_191 = arith.constant 4 : index
    %c0_192 = arith.constant 0 : index
    %c0_193 = arith.constant 0 : index
    %153 = vector.load %arg2[%c4_191, %c0_192, %c0_193] : memref<9x8x128xf32, #tpu.memory_space<vmem>>, vector<1x8x128xf32>
    %154 = vector.shape_cast %153 : vector<1x8x128xf32> to vector<8x128xf32>
    %cst_194 = arith.constant dense<0.000000e+00> : vector<14x128xf32>
    %155 = tpu.matmul %152, %154, %cst_194 {dimension_numbers = #tpu.dot_dimension_numbers<[1], [0], [0], [1], [0, 0, 1, 1], [], []>} : vector<14x8xf32>, vector<8x128xf32>, vector<14x128xf32> -> vector<14x128xf32>
    %156 = arith.addf %150, %155 : vector<14x128xf32>
    %c0_195 = arith.constant 0 : index
    %c5_196 = arith.constant 5 : index
    %c2_197 = arith.constant 2 : index
    %c0_198 = arith.constant 0 : index
    %157 = vector.load %arg1[%c0_195, %c5_196, %c2_197, %c0_198] : memref<1x16x16x8xf32, #tpu.memory_space<vmem>>, vector<1x1x14x8xf32>
    %158 = vector.shape_cast %157 : vector<1x1x14x8xf32> to vector<14x8xf32>
    %c5_199 = arith.constant 5 : index
    %c0_200 = arith.constant 0 : index
    %c0_201 = arith.constant 0 : index
    %159 = vector.load %arg2[%c5_199, %c0_200, %c0_201] : memref<9x8x128xf32, #tpu.memory_space<vmem>>, vector<1x8x128xf32>
    %160 = vector.shape_cast %159 : vector<1x8x128xf32> to vector<8x128xf32>
    %cst_202 = arith.constant dense<0.000000e+00> : vector<14x128xf32>
    %161 = tpu.matmul %158, %160, %cst_202 {dimension_numbers = #tpu.dot_dimension_numbers<[1], [0], [0], [1], [0, 0, 1, 1], [], []>} : vector<14x8xf32>, vector<8x128xf32>, vector<14x128xf32> -> vector<14x128xf32>
    %162 = arith.addf %156, %161 : vector<14x128xf32>
    %c0_203 = arith.constant 0 : index
    %c6_204 = arith.constant 6 : index
    %c0_205 = arith.constant 0 : index
    %c0_206 = arith.constant 0 : index
    %163 = vector.load %arg1[%c0_203, %c6_204, %c0_205, %c0_206] : memref<1x16x16x8xf32, #tpu.memory_space<vmem>>, vector<1x1x14x8xf32>
    %164 = vector.shape_cast %163 : vector<1x1x14x8xf32> to vector<14x8xf32>
    %c6_207 = arith.constant 6 : index
    %c0_208 = arith.constant 0 : index
    %c0_209 = arith.constant 0 : index
    %165 = vector.load %arg2[%c6_207, %c0_208, %c0_209] : memref<9x8x128xf32, #tpu.memory_space<vmem>>, vector<1x8x128xf32>
    %166 = vector.shape_cast %165 : vector<1x8x128xf32> to vector<8x128xf32>
    %cst_210 = arith.constant dense<0.000000e+00> : vector<14x128xf32>
    %167 = tpu.matmul %164, %166, %cst_210 {dimension_numbers = #tpu.dot_dimension_numbers<[1], [0], [0], [1], [0, 0, 1, 1], [], []>} : vector<14x8xf32>, vector<8x128xf32>, vector<14x128xf32> -> vector<14x128xf32>
    %168 = arith.addf %162, %167 : vector<14x128xf32>
    %c0_211 = arith.constant 0 : index
    %c6_212 = arith.constant 6 : index
    %c1_213 = arith.constant 1 : index
    %c0_214 = arith.constant 0 : index
    %169 = vector.load %arg1[%c0_211, %c6_212, %c1_213, %c0_214] : memref<1x16x16x8xf32, #tpu.memory_space<vmem>>, vector<1x1x14x8xf32>
    %170 = vector.shape_cast %169 : vector<1x1x14x8xf32> to vector<14x8xf32>
    %c7_215 = arith.constant 7 : index
    %c0_216 = arith.constant 0 : index
    %c0_217 = arith.constant 0 : index
    %171 = vector.load %arg2[%c7_215, %c0_216, %c0_217] : memref<9x8x128xf32, #tpu.memory_space<vmem>>, vector<1x8x128xf32>
    %172 = vector.shape_cast %171 : vector<1x8x128xf32> to vector<8x128xf32>
    %cst_218 = arith.constant dense<0.000000e+00> : vector<14x128xf32>
    %173 = tpu.matmul %170, %172, %cst_218 {dimension_numbers = #tpu.dot_dimension_numbers<[1], [0], [0], [1], [0, 0, 1, 1], [], []>} : vector<14x8xf32>, vector<8x128xf32>, vector<14x128xf32> -> vector<14x128xf32>
    %174 = arith.addf %168, %173 : vector<14x128xf32>
    %c0_219 = arith.constant 0 : index
    %c6_220 = arith.constant 6 : index
    %c2_221 = arith.constant 2 : index
    %c0_222 = arith.constant 0 : index
    %175 = vector.load %arg1[%c0_219, %c6_220, %c2_221, %c0_222] : memref<1x16x16x8xf32, #tpu.memory_space<vmem>>, vector<1x1x14x8xf32>
    %176 = vector.shape_cast %175 : vector<1x1x14x8xf32> to vector<14x8xf32>
    %c8_223 = arith.constant 8 : index
    %c0_224 = arith.constant 0 : index
    %c0_225 = arith.constant 0 : index
    %177 = vector.load %arg2[%c8_223, %c0_224, %c0_225] : memref<9x8x128xf32, #tpu.memory_space<vmem>>, vector<1x8x128xf32>
    %178 = vector.shape_cast %177 : vector<1x8x128xf32> to vector<8x128xf32>
    %cst_226 = arith.constant dense<0.000000e+00> : vector<14x128xf32>
    %179 = tpu.matmul %176, %178, %cst_226 {dimension_numbers = #tpu.dot_dimension_numbers<[1], [0], [0], [1], [0, 0, 1, 1], [], []>} : vector<14x8xf32>, vector<8x128xf32>, vector<14x128xf32> -> vector<14x128xf32>
    %180 = arith.addf %174, %179 : vector<14x128xf32>
    %c0_227 = arith.constant 0 : index
    %c0_228 = arith.constant 0 : index
    %181 = vector.load %arg5[%c0_227, %c0_228] : memref<14x128xf32, #tpu.memory_space<vmem>>, vector<14x128xf32>
    tpu.vector_store %arg5[%c0_227, %c0_228], %180 {strides = array<i32>} : memref<14x128xf32, #tpu.memory_space<vmem>>, vector<14x128xf32>,
    %c0_229 = arith.constant 0 : index
    %c0_230 = arith.constant 0 : index
    %182 = tpu.strided_load %arg5[%c0_229, %c0_230] {strides = array<i32: 2, 1>} : memref<14x128xf32, #tpu.memory_space<vmem>>, vector<7x128xf32>
    %c0_231 = arith.constant 0 : index
    %c0_232 = arith.constant 0 : index
    %183 = vector.load %arg3[%c0_231, %c0_232] : memref<1x128xf32, #tpu.memory_space<vmem>>, vector<1x128xf32>
    %184 = vector.broadcast %183 : vector<1x128xf32> to vector<7x128xf32>
    %185 = arith.addf %182, %184 : vector<7x128xf32>
    %cst_233 = arith.constant 0.000000e+00 : f32
    %186 = vector.broadcast %cst_233 : f32 to vector<7x128xf32>
    %187 = arith.maximumf %185, %186 : vector<7x128xf32>
    %c14 = arith.constant 14 : index
    %c0_234 = arith.constant 0 : index
    %188 = vector.load %arg6[%c14, %c0_234] : memref<49x128xf32, #tpu.memory_space<vmem>>, vector<7x128xf32>
    tpu.vector_store %arg6[%c14, %c0_234], %187 {strides = array<i32>} : memref<49x128xf32, #tpu.memory_space<vmem>>, vector<7x128xf32>,
    %cst_235 = arith.constant 0.000000e+00 : f32
    %189 = vector.broadcast %cst_235 : f32 to vector<14x128xf32>
    %c0_236 = arith.constant 0 : index
    %c6_237 = arith.constant 6 : index
    %c0_238 = arith.constant 0 : index
    %c0_239 = arith.constant 0 : index
    %190 = vector.load %arg1[%c0_236, %c6_237, %c0_238, %c0_239] : memref<1x16x16x8xf32, #tpu.memory_space<vmem>>, vector<1x1x14x8xf32>
    %191 = vector.shape_cast %190 : vector<1x1x14x8xf32> to vector<14x8xf32>
    %c0_240 = arith.constant 0 : index
    %c0_241 = arith.constant 0 : index
    %c0_242 = arith.constant 0 : index
    %192 = vector.load %arg2[%c0_240, %c0_241, %c0_242] : memref<9x8x128xf32, #tpu.memory_space<vmem>>, vector<1x8x128xf32>
    %193 = vector.shape_cast %192 : vector<1x8x128xf32> to vector<8x128xf32>
    %cst_243 = arith.constant dense<0.000000e+00> : vector<14x128xf32>
    %194 = tpu.matmul %191, %193, %cst_243 {dimension_numbers = #tpu.dot_dimension_numbers<[1], [0], [0], [1], [0, 0, 1, 1], [], []>} : vector<14x8xf32>, vector<8x128xf32>, vector<14x128xf32> -> vector<14x128xf32>
    %195 = arith.addf %189, %194 : vector<14x128xf32>
    %c0_244 = arith.constant 0 : index
    %c6_245 = arith.constant 6 : index
    %c1_246 = arith.constant 1 : index
    %c0_247 = arith.constant 0 : index
    %196 = vector.load %arg1[%c0_244, %c6_245, %c1_246, %c0_247] : memref<1x16x16x8xf32, #tpu.memory_space<vmem>>, vector<1x1x14x8xf32>
    %197 = vector.shape_cast %196 : vector<1x1x14x8xf32> to vector<14x8xf32>
    %c1_248 = arith.constant 1 : index
    %c0_249 = arith.constant 0 : index
    %c0_250 = arith.constant 0 : index
    %198 = vector.load %arg2[%c1_248, %c0_249, %c0_250] : memref<9x8x128xf32, #tpu.memory_space<vmem>>, vector<1x8x128xf32>
    %199 = vector.shape_cast %198 : vector<1x8x128xf32> to vector<8x128xf32>
    %cst_251 = arith.constant dense<0.000000e+00> : vector<14x128xf32>
    %200 = tpu.matmul %197, %199, %cst_251 {dimension_numbers = #tpu.dot_dimension_numbers<[1], [0], [0], [1], [0, 0, 1, 1], [], []>} : vector<14x8xf32>, vector<8x128xf32>, vector<14x128xf32> -> vector<14x128xf32>
    %201 = arith.addf %195, %200 : vector<14x128xf32>
    %c0_252 = arith.constant 0 : index
    %c6_253 = arith.constant 6 : index
    %c2_254 = arith.constant 2 : index
    %c0_255 = arith.constant 0 : index
    %202 = vector.load %arg1[%c0_252, %c6_253, %c2_254, %c0_255] : memref<1x16x16x8xf32, #tpu.memory_space<vmem>>, vector<1x1x14x8xf32>
    %203 = vector.shape_cast %202 : vector<1x1x14x8xf32> to vector<14x8xf32>
    %c2_256 = arith.constant 2 : index
    %c0_257 = arith.constant 0 : index
    %c0_258 = arith.constant 0 : index
    %204 = vector.load %arg2[%c2_256, %c0_257, %c0_258] : memref<9x8x128xf32, #tpu.memory_space<vmem>>, vector<1x8x128xf32>
    %205 = vector.shape_cast %204 : vector<1x8x128xf32> to vector<8x128xf32>
    %cst_259 = arith.constant dense<0.000000e+00> : vector<14x128xf32>
    %206 = tpu.matmul %203, %205, %cst_259 {dimension_numbers = #tpu.dot_dimension_numbers<[1], [0], [0], [1], [0, 0, 1, 1], [], []>} : vector<14x8xf32>, vector<8x128xf32>, vector<14x128xf32> -> vector<14x128xf32>
    %207 = arith.addf %201, %206 : vector<14x128xf32>
    %c0_260 = arith.constant 0 : index
    %c7_261 = arith.constant 7 : index
    %c0_262 = arith.constant 0 : index
    %c0_263 = arith.constant 0 : index
    %208 = vector.load %arg1[%c0_260, %c7_261, %c0_262, %c0_263] : memref<1x16x16x8xf32, #tpu.memory_space<vmem>>, vector<1x1x14x8xf32>
    %209 = vector.shape_cast %208 : vector<1x1x14x8xf32> to vector<14x8xf32>
    %c3_264 = arith.constant 3 : index
    %c0_265 = arith.constant 0 : index
    %c0_266 = arith.constant 0 : index
    %210 = vector.load %arg2[%c3_264, %c0_265, %c0_266] : memref<9x8x128xf32, #tpu.memory_space<vmem>>, vector<1x8x128xf32>
    %211 = vector.shape_cast %210 : vector<1x8x128xf32> to vector<8x128xf32>
    %cst_267 = arith.constant dense<0.000000e+00> : vector<14x128xf32>
    %212 = tpu.matmul %209, %211, %cst_267 {dimension_numbers = #tpu.dot_dimension_numbers<[1], [0], [0], [1], [0, 0, 1, 1], [], []>} : vector<14x8xf32>, vector<8x128xf32>, vector<14x128xf32> -> vector<14x128xf32>
    %213 = arith.addf %207, %212 : vector<14x128xf32>
    %c0_268 = arith.constant 0 : index
    %c7_269 = arith.constant 7 : index
    %c1_270 = arith.constant 1 : index
    %c0_271 = arith.constant 0 : index
    %214 = vector.load %arg1[%c0_268, %c7_269, %c1_270, %c0_271] : memref<1x16x16x8xf32, #tpu.memory_space<vmem>>, vector<1x1x14x8xf32>
    %215 = vector.shape_cast %214 : vector<1x1x14x8xf32> to vector<14x8xf32>
    %c4_272 = arith.constant 4 : index
    %c0_273 = arith.constant 0 : index
    %c0_274 = arith.constant 0 : index
    %216 = vector.load %arg2[%c4_272, %c0_273, %c0_274] : memref<9x8x128xf32, #tpu.memory_space<vmem>>, vector<1x8x128xf32>
    %217 = vector.shape_cast %216 : vector<1x8x128xf32> to vector<8x128xf32>
    %cst_275 = arith.constant dense<0.000000e+00> : vector<14x128xf32>
    %218 = tpu.matmul %215, %217, %cst_275 {dimension_numbers = #tpu.dot_dimension_numbers<[1], [0], [0], [1], [0, 0, 1, 1], [], []>} : vector<14x8xf32>, vector<8x128xf32>, vector<14x128xf32> -> vector<14x128xf32>
    %219 = arith.addf %213, %218 : vector<14x128xf32>
    %c0_276 = arith.constant 0 : index
    %c7_277 = arith.constant 7 : index
    %c2_278 = arith.constant 2 : index
    %c0_279 = arith.constant 0 : index
    %220 = vector.load %arg1[%c0_276, %c7_277, %c2_278, %c0_279] : memref<1x16x16x8xf32, #tpu.memory_space<vmem>>, vector<1x1x14x8xf32>
    %221 = vector.shape_cast %220 : vector<1x1x14x8xf32> to vector<14x8xf32>
    %c5_280 = arith.constant 5 : index
    %c0_281 = arith.constant 0 : index
    %c0_282 = arith.constant 0 : index
    %222 = vector.load %arg2[%c5_280, %c0_281, %c0_282] : memref<9x8x128xf32, #tpu.memory_space<vmem>>, vector<1x8x128xf32>
    %223 = vector.shape_cast %222 : vector<1x8x128xf32> to vector<8x128xf32>
    %cst_283 = arith.constant dense<0.000000e+00> : vector<14x128xf32>
    %224 = tpu.matmul %221, %223, %cst_283 {dimension_numbers = #tpu.dot_dimension_numbers<[1], [0], [0], [1], [0, 0, 1, 1], [], []>} : vector<14x8xf32>, vector<8x128xf32>, vector<14x128xf32> -> vector<14x128xf32>
    %225 = arith.addf %219, %224 : vector<14x128xf32>
    %c0_284 = arith.constant 0 : index
    %c8_285 = arith.constant 8 : index
    %c0_286 = arith.constant 0 : index
    %c0_287 = arith.constant 0 : index
    %226 = vector.load %arg1[%c0_284, %c8_285, %c0_286, %c0_287] : memref<1x16x16x8xf32, #tpu.memory_space<vmem>>, vector<1x1x14x8xf32>
    %227 = vector.shape_cast %226 : vector<1x1x14x8xf32> to vector<14x8xf32>
    %c6_288 = arith.constant 6 : index
    %c0_289 = arith.constant 0 : index
    %c0_290 = arith.constant 0 : index
    %228 = vector.load %arg2[%c6_288, %c0_289, %c0_290] : memref<9x8x128xf32, #tpu.memory_space<vmem>>, vector<1x8x128xf32>
    %229 = vector.shape_cast %228 : vector<1x8x128xf32> to vector<8x128xf32>
    %cst_291 = arith.constant dense<0.000000e+00> : vector<14x128xf32>
    %230 = tpu.matmul %227, %229, %cst_291 {dimension_numbers = #tpu.dot_dimension_numbers<[1], [0], [0], [1], [0, 0, 1, 1], [], []>} : vector<14x8xf32>, vector<8x128xf32>, vector<14x128xf32> -> vector<14x128xf32>
    %231 = arith.addf %225, %230 : vector<14x128xf32>
    %c0_292 = arith.constant 0 : index
    %c8_293 = arith.constant 8 : index
    %c1_294 = arith.constant 1 : index
    %c0_295 = arith.constant 0 : index
    %232 = vector.load %arg1[%c0_292, %c8_293, %c1_294, %c0_295] : memref<1x16x16x8xf32, #tpu.memory_space<vmem>>, vector<1x1x14x8xf32>
    %233 = vector.shape_cast %232 : vector<1x1x14x8xf32> to vector<14x8xf32>
    %c7_296 = arith.constant 7 : index
    %c0_297 = arith.constant 0 : index
    %c0_298 = arith.constant 0 : index
    %234 = vector.load %arg2[%c7_296, %c0_297, %c0_298] : memref<9x8x128xf32, #tpu.memory_space<vmem>>, vector<1x8x128xf32>
    %235 = vector.shape_cast %234 : vector<1x8x128xf32> to vector<8x128xf32>
    %cst_299 = arith.constant dense<0.000000e+00> : vector<14x128xf32>
    %236 = tpu.matmul %233, %235, %cst_299 {dimension_numbers = #tpu.dot_dimension_numbers<[1], [0], [0], [1], [0, 0, 1, 1], [], []>} : vector<14x8xf32>, vector<8x128xf32>, vector<14x128xf32> -> vector<14x128xf32>
    %237 = arith.addf %231, %236 : vector<14x128xf32>
    %c0_300 = arith.constant 0 : index
    %c8_301 = arith.constant 8 : index
    %c2_302 = arith.constant 2 : index
    %c0_303 = arith.constant 0 : index
    %238 = vector.load %arg1[%c0_300, %c8_301, %c2_302, %c0_303] : memref<1x16x16x8xf32, #tpu.memory_space<vmem>>, vector<1x1x14x8xf32>
    %239 = vector.shape_cast %238 : vector<1x1x14x8xf32> to vector<14x8xf32>
    %c8_304 = arith.constant 8 : index
    %c0_305 = arith.constant 0 : index
    %c0_306 = arith.constant 0 : index
    %240 = vector.load %arg2[%c8_304, %c0_305, %c0_306] : memref<9x8x128xf32, #tpu.memory_space<vmem>>, vector<1x8x128xf32>
    %241 = vector.shape_cast %240 : vector<1x8x128xf32> to vector<8x128xf32>
    %cst_307 = arith.constant dense<0.000000e+00> : vector<14x128xf32>
    %242 = tpu.matmul %239, %241, %cst_307 {dimension_numbers = #tpu.dot_dimension_numbers<[1], [0], [0], [1], [0, 0, 1, 1], [], []>} : vector<14x8xf32>, vector<8x128xf32>, vector<14x128xf32> -> vector<14x128xf32>
    %243 = arith.addf %237, %242 : vector<14x128xf32>
    %c0_308 = arith.constant 0 : index
    %c0_309 = arith.constant 0 : index
    %244 = vector.load %arg5[%c0_308, %c0_309] : memref<14x128xf32, #tpu.memory_space<vmem>>, vector<14x128xf32>
    tpu.vector_store %arg5[%c0_308, %c0_309], %243 {strides = array<i32>} : memref<14x128xf32, #tpu.memory_space<vmem>>, vector<14x128xf32>,
    %c0_310 = arith.constant 0 : index
    %c0_311 = arith.constant 0 : index
    %245 = tpu.strided_load %arg5[%c0_310, %c0_311] {strides = array<i32: 2, 1>} : memref<14x128xf32, #tpu.memory_space<vmem>>, vector<7x128xf32>
    %c0_312 = arith.constant 0 : index
    %c0_313 = arith.constant 0 : index
    %246 = vector.load %arg3[%c0_312, %c0_313] : memref<1x128xf32, #tpu.memory_space<vmem>>, vector<1x128xf32>
    %247 = vector.broadcast %246 : vector<1x128xf32> to vector<7x128xf32>
    %248 = arith.addf %245, %247 : vector<7x128xf32>
    %cst_314 = arith.constant 0.000000e+00 : f32
    %249 = vector.broadcast %cst_314 : f32 to vector<7x128xf32>
    %250 = arith.maximumf %248, %249 : vector<7x128xf32>
    %c21 = arith.constant 21 : index
    %c0_315 = arith.constant 0 : index
    %251 = vector.load %arg6[%c21, %c0_315] : memref<49x128xf32, #tpu.memory_space<vmem>>, vector<7x128xf32>
    tpu.vector_store %arg6[%c21, %c0_315], %250 {strides = array<i32>} : memref<49x128xf32, #tpu.memory_space<vmem>>, vector<7x128xf32>,
    %cst_316 = arith.constant 0.000000e+00 : f32
    %252 = vector.broadcast %cst_316 : f32 to vector<14x128xf32>
    %c0_317 = arith.constant 0 : index
    %c8_318 = arith.constant 8 : index
    %c0_319 = arith.constant 0 : index
    %c0_320 = arith.constant 0 : index
    %253 = vector.load %arg1[%c0_317, %c8_318, %c0_319, %c0_320] : memref<1x16x16x8xf32, #tpu.memory_space<vmem>>, vector<1x1x14x8xf32>
    %254 = vector.shape_cast %253 : vector<1x1x14x8xf32> to vector<14x8xf32>
    %c0_321 = arith.constant 0 : index
    %c0_322 = arith.constant 0 : index
    %c0_323 = arith.constant 0 : index
    %255 = vector.load %arg2[%c0_321, %c0_322, %c0_323] : memref<9x8x128xf32, #tpu.memory_space<vmem>>, vector<1x8x128xf32>
    %256 = vector.shape_cast %255 : vector<1x8x128xf32> to vector<8x128xf32>
    %cst_324 = arith.constant dense<0.000000e+00> : vector<14x128xf32>
    %257 = tpu.matmul %254, %256, %cst_324 {dimension_numbers = #tpu.dot_dimension_numbers<[1], [0], [0], [1], [0, 0, 1, 1], [], []>} : vector<14x8xf32>, vector<8x128xf32>, vector<14x128xf32> -> vector<14x128xf32>
    %258 = arith.addf %252, %257 : vector<14x128xf32>
    %c0_325 = arith.constant 0 : index
    %c8_326 = arith.constant 8 : index
    %c1_327 = arith.constant 1 : index
    %c0_328 = arith.constant 0 : index
    %259 = vector.load %arg1[%c0_325, %c8_326, %c1_327, %c0_328] : memref<1x16x16x8xf32, #tpu.memory_space<vmem>>, vector<1x1x14x8xf32>
    %260 = vector.shape_cast %259 : vector<1x1x14x8xf32> to vector<14x8xf32>
    %c1_329 = arith.constant 1 : index
    %c0_330 = arith.constant 0 : index
    %c0_331 = arith.constant 0 : index
    %261 = vector.load %arg2[%c1_329, %c0_330, %c0_331] : memref<9x8x128xf32, #tpu.memory_space<vmem>>, vector<1x8x128xf32>
    %262 = vector.shape_cast %261 : vector<1x8x128xf32> to vector<8x128xf32>
    %cst_332 = arith.constant dense<0.000000e+00> : vector<14x128xf32>
    %263 = tpu.matmul %260, %262, %cst_332 {dimension_numbers = #tpu.dot_dimension_numbers<[1], [0], [0], [1], [0, 0, 1, 1], [], []>} : vector<14x8xf32>, vector<8x128xf32>, vector<14x128xf32> -> vector<14x128xf32>
    %264 = arith.addf %258, %263 : vector<14x128xf32>
    %c0_333 = arith.constant 0 : index
    %c8_334 = arith.constant 8 : index
    %c2_335 = arith.constant 2 : index
    %c0_336 = arith.constant 0 : index
    %265 = vector.load %arg1[%c0_333, %c8_334, %c2_335, %c0_336] : memref<1x16x16x8xf32, #tpu.memory_space<vmem>>, vector<1x1x14x8xf32>
    %266 = vector.shape_cast %265 : vector<1x1x14x8xf32> to vector<14x8xf32>
    %c2_337 = arith.constant 2 : index
    %c0_338 = arith.constant 0 : index
    %c0_339 = arith.constant 0 : index
    %267 = vector.load %arg2[%c2_337, %c0_338, %c0_339] : memref<9x8x128xf32, #tpu.memory_space<vmem>>, vector<1x8x128xf32>
    %268 = vector.shape_cast %267 : vector<1x8x128xf32> to vector<8x128xf32>
    %cst_340 = arith.constant dense<0.000000e+00> : vector<14x128xf32>
    %269 = tpu.matmul %266, %268, %cst_340 {dimension_numbers = #tpu.dot_dimension_numbers<[1], [0], [0], [1], [0, 0, 1, 1], [], []>} : vector<14x8xf32>, vector<8x128xf32>, vector<14x128xf32> -> vector<14x128xf32>
    %270 = arith.addf %264, %269 : vector<14x128xf32>
    %c0_341 = arith.constant 0 : index
    %c9 = arith.constant 9 : index
    %c0_342 = arith.constant 0 : index
    %c0_343 = arith.constant 0 : index
    %271 = vector.load %arg1[%c0_341, %c9, %c0_342, %c0_343] : memref<1x16x16x8xf32, #tpu.memory_space<vmem>>, vector<1x1x14x8xf32>
    %272 = vector.shape_cast %271 : vector<1x1x14x8xf32> to vector<14x8xf32>
    %c3_344 = arith.constant 3 : index
    %c0_345 = arith.constant 0 : index
    %c0_346 = arith.constant 0 : index
    %273 = vector.load %arg2[%c3_344, %c0_345, %c0_346] : memref<9x8x128xf32, #tpu.memory_space<vmem>>, vector<1x8x128xf32>
    %274 = vector.shape_cast %273 : vector<1x8x128xf32> to vector<8x128xf32>
    %cst_347 = arith.constant dense<0.000000e+00> : vector<14x128xf32>
    %275 = tpu.matmul %272, %274, %cst_347 {dimension_numbers = #tpu.dot_dimension_numbers<[1], [0], [0], [1], [0, 0, 1, 1], [], []>} : vector<14x8xf32>, vector<8x128xf32>, vector<14x128xf32> -> vector<14x128xf32>
    %276 = arith.addf %270, %275 : vector<14x128xf32>
    %c0_348 = arith.constant 0 : index
    %c9_349 = arith.constant 9 : index
    %c1_350 = arith.constant 1 : index
    %c0_351 = arith.constant 0 : index
    %277 = vector.load %arg1[%c0_348, %c9_349, %c1_350, %c0_351] : memref<1x16x16x8xf32, #tpu.memory_space<vmem>>, vector<1x1x14x8xf32>
    %278 = vector.shape_cast %277 : vector<1x1x14x8xf32> to vector<14x8xf32>
    %c4_352 = arith.constant 4 : index
    %c0_353 = arith.constant 0 : index
    %c0_354 = arith.constant 0 : index
    %279 = vector.load %arg2[%c4_352, %c0_353, %c0_354] : memref<9x8x128xf32, #tpu.memory_space<vmem>>, vector<1x8x128xf32>
    %280 = vector.shape_cast %279 : vector<1x8x128xf32> to vector<8x128xf32>
    %cst_355 = arith.constant dense<0.000000e+00> : vector<14x128xf32>
    %281 = tpu.matmul %278, %280, %cst_355 {dimension_numbers = #tpu.dot_dimension_numbers<[1], [0], [0], [1], [0, 0, 1, 1], [], []>} : vector<14x8xf32>, vector<8x128xf32>, vector<14x128xf32> -> vector<14x128xf32>
    %282 = arith.addf %276, %281 : vector<14x128xf32>
    %c0_356 = arith.constant 0 : index
    %c9_357 = arith.constant 9 : index
    %c2_358 = arith.constant 2 : index
    %c0_359 = arith.constant 0 : index
    %283 = vector.load %arg1[%c0_356, %c9_357, %c2_358, %c0_359] : memref<1x16x16x8xf32, #tpu.memory_space<vmem>>, vector<1x1x14x8xf32>
    %284 = vector.shape_cast %283 : vector<1x1x14x8xf32> to vector<14x8xf32>
    %c5_360 = arith.constant 5 : index
    %c0_361 = arith.constant 0 : index
    %c0_362 = arith.constant 0 : index
    %285 = vector.load %arg2[%c5_360, %c0_361, %c0_362] : memref<9x8x128xf32, #tpu.memory_space<vmem>>, vector<1x8x128xf32>
    %286 = vector.shape_cast %285 : vector<1x8x128xf32> to vector<8x128xf32>
    %cst_363 = arith.constant dense<0.000000e+00> : vector<14x128xf32>
    %287 = tpu.matmul %284, %286, %cst_363 {dimension_numbers = #tpu.dot_dimension_numbers<[1], [0], [0], [1], [0, 0, 1, 1], [], []>} : vector<14x8xf32>, vector<8x128xf32>, vector<14x128xf32> -> vector<14x128xf32>
    %288 = arith.addf %282, %287 : vector<14x128xf32>
    %c0_364 = arith.constant 0 : index
    %c10 = arith.constant 10 : index
    %c0_365 = arith.constant 0 : index
    %c0_366 = arith.constant 0 : index
    %289 = vector.load %arg1[%c0_364, %c10, %c0_365, %c0_366] : memref<1x16x16x8xf32, #tpu.memory_space<vmem>>, vector<1x1x14x8xf32>
    %290 = vector.shape_cast %289 : vector<1x1x14x8xf32> to vector<14x8xf32>
    %c6_367 = arith.constant 6 : index
    %c0_368 = arith.constant 0 : index
    %c0_369 = arith.constant 0 : index
    %291 = vector.load %arg2[%c6_367, %c0_368, %c0_369] : memref<9x8x128xf32, #tpu.memory_space<vmem>>, vector<1x8x128xf32>
    %292 = vector.shape_cast %291 : vector<1x8x128xf32> to vector<8x128xf32>
    %cst_370 = arith.constant dense<0.000000e+00> : vector<14x128xf32>
    %293 = tpu.matmul %290, %292, %cst_370 {dimension_numbers = #tpu.dot_dimension_numbers<[1], [0], [0], [1], [0, 0, 1, 1], [], []>} : vector<14x8xf32>, vector<8x128xf32>, vector<14x128xf32> -> vector<14x128xf32>
    %294 = arith.addf %288, %293 : vector<14x128xf32>
    %c0_371 = arith.constant 0 : index
    %c10_372 = arith.constant 10 : index
    %c1_373 = arith.constant 1 : index
    %c0_374 = arith.constant 0 : index
    %295 = vector.load %arg1[%c0_371, %c10_372, %c1_373, %c0_374] : memref<1x16x16x8xf32, #tpu.memory_space<vmem>>, vector<1x1x14x8xf32>
    %296 = vector.shape_cast %295 : vector<1x1x14x8xf32> to vector<14x8xf32>
    %c7_375 = arith.constant 7 : index
    %c0_376 = arith.constant 0 : index
    %c0_377 = arith.constant 0 : index
    %297 = vector.load %arg2[%c7_375, %c0_376, %c0_377] : memref<9x8x128xf32, #tpu.memory_space<vmem>>, vector<1x8x128xf32>
    %298 = vector.shape_cast %297 : vector<1x8x128xf32> to vector<8x128xf32>
    %cst_378 = arith.constant dense<0.000000e+00> : vector<14x128xf32>
    %299 = tpu.matmul %296, %298, %cst_378 {dimension_numbers = #tpu.dot_dimension_numbers<[1], [0], [0], [1], [0, 0, 1, 1], [], []>} : vector<14x8xf32>, vector<8x128xf32>, vector<14x128xf32> -> vector<14x128xf32>
    %300 = arith.addf %294, %299 : vector<14x128xf32>
    %c0_379 = arith.constant 0 : index
    %c10_380 = arith.constant 10 : index
    %c2_381 = arith.constant 2 : index
    %c0_382 = arith.constant 0 : index
    %301 = vector.load %arg1[%c0_379, %c10_380, %c2_381, %c0_382] : memref<1x16x16x8xf32, #tpu.memory_space<vmem>>, vector<1x1x14x8xf32>
    %302 = vector.shape_cast %301 : vector<1x1x14x8xf32> to vector<14x8xf32>
    %c8_383 = arith.constant 8 : index
    %c0_384 = arith.constant 0 : index
    %c0_385 = arith.constant 0 : index
    %303 = vector.load %arg2[%c8_383, %c0_384, %c0_385] : memref<9x8x128xf32, #tpu.memory_space<vmem>>, vector<1x8x128xf32>
    %304 = vector.shape_cast %303 : vector<1x8x128xf32> to vector<8x128xf32>
    %cst_386 = arith.constant dense<0.000000e+00> : vector<14x128xf32>
    %305 = tpu.matmul %302, %304, %cst_386 {dimension_numbers = #tpu.dot_dimension_numbers<[1], [0], [0], [1], [0, 0, 1, 1], [], []>} : vector<14x8xf32>, vector<8x128xf32>, vector<14x128xf32> -> vector<14x128xf32>
    %306 = arith.addf %300, %305 : vector<14x128xf32>
    %c0_387 = arith.constant 0 : index
    %c0_388 = arith.constant 0 : index
    %307 = vector.load %arg5[%c0_387, %c0_388] : memref<14x128xf32, #tpu.memory_space<vmem>>, vector<14x128xf32>
    tpu.vector_store %arg5[%c0_387, %c0_388], %306 {strides = array<i32>} : memref<14x128xf32, #tpu.memory_space<vmem>>, vector<14x128xf32>,
    %c0_389 = arith.constant 0 : index
    %c0_390 = arith.constant 0 : index
    %308 = tpu.strided_load %arg5[%c0_389, %c0_390] {strides = array<i32: 2, 1>} : memref<14x128xf32, #tpu.memory_space<vmem>>, vector<7x128xf32>
    %c0_391 = arith.constant 0 : index
    %c0_392 = arith.constant 0 : index
    %309 = vector.load %arg3[%c0_391, %c0_392] : memref<1x128xf32, #tpu.memory_space<vmem>>, vector<1x128xf32>
    %310 = vector.broadcast %309 : vector<1x128xf32> to vector<7x128xf32>
    %311 = arith.addf %308, %310 : vector<7x128xf32>
    %cst_393 = arith.constant 0.000000e+00 : f32
    %312 = vector.broadcast %cst_393 : f32 to vector<7x128xf32>
    %313 = arith.maximumf %311, %312 : vector<7x128xf32>
    %c28 = arith.constant 28 : index
    %c0_394 = arith.constant 0 : index
    %314 = vector.load %arg6[%c28, %c0_394] : memref<49x128xf32, #tpu.memory_space<vmem>>, vector<7x128xf32>
    tpu.vector_store %arg6[%c28, %c0_394], %313 {strides = array<i32>} : memref<49x128xf32, #tpu.memory_space<vmem>>, vector<7x128xf32>,
    %cst_395 = arith.constant 0.000000e+00 : f32
    %315 = vector.broadcast %cst_395 : f32 to vector<14x128xf32>
    %c0_396 = arith.constant 0 : index
    %c10_397 = arith.constant 10 : index
    %c0_398 = arith.constant 0 : index
    %c0_399 = arith.constant 0 : index
    %316 = vector.load %arg1[%c0_396, %c10_397, %c0_398, %c0_399] : memref<1x16x16x8xf32, #tpu.memory_space<vmem>>, vector<1x1x14x8xf32>
    %317 = vector.shape_cast %316 : vector<1x1x14x8xf32> to vector<14x8xf32>
    %c0_400 = arith.constant 0 : index
    %c0_401 = arith.constant 0 : index
    %c0_402 = arith.constant 0 : index
    %318 = vector.load %arg2[%c0_400, %c0_401, %c0_402] : memref<9x8x128xf32, #tpu.memory_space<vmem>>, vector<1x8x128xf32>
    %319 = vector.shape_cast %318 : vector<1x8x128xf32> to vector<8x128xf32>
    %cst_403 = arith.constant dense<0.000000e+00> : vector<14x128xf32>
    %320 = tpu.matmul %317, %319, %cst_403 {dimension_numbers = #tpu.dot_dimension_numbers<[1], [0], [0], [1], [0, 0, 1, 1], [], []>} : vector<14x8xf32>, vector<8x128xf32>, vector<14x128xf32> -> vector<14x128xf32>
    %321 = arith.addf %315, %320 : vector<14x128xf32>
    %c0_404 = arith.constant 0 : index
    %c10_405 = arith.constant 10 : index
    %c1_406 = arith.constant 1 : index
    %c0_407 = arith.constant 0 : index
    %322 = vector.load %arg1[%c0_404, %c10_405, %c1_406, %c0_407] : memref<1x16x16x8xf32, #tpu.memory_space<vmem>>, vector<1x1x14x8xf32>
    %323 = vector.shape_cast %322 : vector<1x1x14x8xf32> to vector<14x8xf32>
    %c1_408 = arith.constant 1 : index
    %c0_409 = arith.constant 0 : index
    %c0_410 = arith.constant 0 : index
    %324 = vector.load %arg2[%c1_408, %c0_409, %c0_410] : memref<9x8x128xf32, #tpu.memory_space<vmem>>, vector<1x8x128xf32>
    %325 = vector.shape_cast %324 : vector<1x8x128xf32> to vector<8x128xf32>
    %cst_411 = arith.constant dense<0.000000e+00> : vector<14x128xf32>
    %326 = tpu.matmul %323, %325, %cst_411 {dimension_numbers = #tpu.dot_dimension_numbers<[1], [0], [0], [1], [0, 0, 1, 1], [], []>} : vector<14x8xf32>, vector<8x128xf32>, vector<14x128xf32> -> vector<14x128xf32>
    %327 = arith.addf %321, %326 : vector<14x128xf32>
    %c0_412 = arith.constant 0 : index
    %c10_413 = arith.constant 10 : index
    %c2_414 = arith.constant 2 : index
    %c0_415 = arith.constant 0 : index
    %328 = vector.load %arg1[%c0_412, %c10_413, %c2_414, %c0_415] : memref<1x16x16x8xf32, #tpu.memory_space<vmem>>, vector<1x1x14x8xf32>
    %329 = vector.shape_cast %328 : vector<1x1x14x8xf32> to vector<14x8xf32>
    %c2_416 = arith.constant 2 : index
    %c0_417 = arith.constant 0 : index
    %c0_418 = arith.constant 0 : index
    %330 = vector.load %arg2[%c2_416, %c0_417, %c0_418] : memref<9x8x128xf32, #tpu.memory_space<vmem>>, vector<1x8x128xf32>
    %331 = vector.shape_cast %330 : vector<1x8x128xf32> to vector<8x128xf32>
    %cst_419 = arith.constant dense<0.000000e+00> : vector<14x128xf32>
    %332 = tpu.matmul %329, %331, %cst_419 {dimension_numbers = #tpu.dot_dimension_numbers<[1], [0], [0], [1], [0, 0, 1, 1], [], []>} : vector<14x8xf32>, vector<8x128xf32>, vector<14x128xf32> -> vector<14x128xf32>
    %333 = arith.addf %327, %332 : vector<14x128xf32>
    %c0_420 = arith.constant 0 : index
    %c11 = arith.constant 11 : index
    %c0_421 = arith.constant 0 : index
    %c0_422 = arith.constant 0 : index
    %334 = vector.load %arg1[%c0_420, %c11, %c0_421, %c0_422] : memref<1x16x16x8xf32, #tpu.memory_space<vmem>>, vector<1x1x14x8xf32>
    %335 = vector.shape_cast %334 : vector<1x1x14x8xf32> to vector<14x8xf32>
    %c3_423 = arith.constant 3 : index
    %c0_424 = arith.constant 0 : index
    %c0_425 = arith.constant 0 : index
    %336 = vector.load %arg2[%c3_423, %c0_424, %c0_425] : memref<9x8x128xf32, #tpu.memory_space<vmem>>, vector<1x8x128xf32>
    %337 = vector.shape_cast %336 : vector<1x8x128xf32> to vector<8x128xf32>
    %cst_426 = arith.constant dense<0.000000e+00> : vector<14x128xf32>
    %338 = tpu.matmul %335, %337, %cst_426 {dimension_numbers = #tpu.dot_dimension_numbers<[1], [0], [0], [1], [0, 0, 1, 1], [], []>} : vector<14x8xf32>, vector<8x128xf32>, vector<14x128xf32> -> vector<14x128xf32>
    %339 = arith.addf %333, %338 : vector<14x128xf32>
    %c0_427 = arith.constant 0 : index
    %c11_428 = arith.constant 11 : index
    %c1_429 = arith.constant 1 : index
    %c0_430 = arith.constant 0 : index
    %340 = vector.load %arg1[%c0_427, %c11_428, %c1_429, %c0_430] : memref<1x16x16x8xf32, #tpu.memory_space<vmem>>, vector<1x1x14x8xf32>
    %341 = vector.shape_cast %340 : vector<1x1x14x8xf32> to vector<14x8xf32>
    %c4_431 = arith.constant 4 : index
    %c0_432 = arith.constant 0 : index
    %c0_433 = arith.constant 0 : index
    %342 = vector.load %arg2[%c4_431, %c0_432, %c0_433] : memref<9x8x128xf32, #tpu.memory_space<vmem>>, vector<1x8x128xf32>
    %343 = vector.shape_cast %342 : vector<1x8x128xf32> to vector<8x128xf32>
    %cst_434 = arith.constant dense<0.000000e+00> : vector<14x128xf32>
    %344 = tpu.matmul %341, %343, %cst_434 {dimension_numbers = #tpu.dot_dimension_numbers<[1], [0], [0], [1], [0, 0, 1, 1], [], []>} : vector<14x8xf32>, vector<8x128xf32>, vector<14x128xf32> -> vector<14x128xf32>
    %345 = arith.addf %339, %344 : vector<14x128xf32>
    %c0_435 = arith.constant 0 : index
    %c11_436 = arith.constant 11 : index
    %c2_437 = arith.constant 2 : index
    %c0_438 = arith.constant 0 : index
    %346 = vector.load %arg1[%c0_435, %c11_436, %c2_437, %c0_438] : memref<1x16x16x8xf32, #tpu.memory_space<vmem>>, vector<1x1x14x8xf32>
    %347 = vector.shape_cast %346 : vector<1x1x14x8xf32> to vector<14x8xf32>
    %c5_439 = arith.constant 5 : index
    %c0_440 = arith.constant 0 : index
    %c0_441 = arith.constant 0 : index
    %348 = vector.load %arg2[%c5_439, %c0_440, %c0_441] : memref<9x8x128xf32, #tpu.memory_space<vmem>>, vector<1x8x128xf32>
    %349 = vector.shape_cast %348 : vector<1x8x128xf32> to vector<8x128xf32>
    %cst_442 = arith.constant dense<0.000000e+00> : vector<14x128xf32>
    %350 = tpu.matmul %347, %349, %cst_442 {dimension_numbers = #tpu.dot_dimension_numbers<[1], [0], [0], [1], [0, 0, 1, 1], [], []>} : vector<14x8xf32>, vector<8x128xf32>, vector<14x128xf32> -> vector<14x128xf32>
    %351 = arith.addf %345, %350 : vector<14x128xf32>
    %c0_443 = arith.constant 0 : index
    %c12 = arith.constant 12 : index
    %c0_444 = arith.constant 0 : index
    %c0_445 = arith.constant 0 : index
    %352 = vector.load %arg1[%c0_443, %c12, %c0_444, %c0_445] : memref<1x16x16x8xf32, #tpu.memory_space<vmem>>, vector<1x1x14x8xf32>
    %353 = vector.shape_cast %352 : vector<1x1x14x8xf32> to vector<14x8xf32>
    %c6_446 = arith.constant 6 : index
    %c0_447 = arith.constant 0 : index
    %c0_448 = arith.constant 0 : index
    %354 = vector.load %arg2[%c6_446, %c0_447, %c0_448] : memref<9x8x128xf32, #tpu.memory_space<vmem>>, vector<1x8x128xf32>
    %355 = vector.shape_cast %354 : vector<1x8x128xf32> to vector<8x128xf32>
    %cst_449 = arith.constant dense<0.000000e+00> : vector<14x128xf32>
    %356 = tpu.matmul %353, %355, %cst_449 {dimension_numbers = #tpu.dot_dimension_numbers<[1], [0], [0], [1], [0, 0, 1, 1], [], []>} : vector<14x8xf32>, vector<8x128xf32>, vector<14x128xf32> -> vector<14x128xf32>
    %357 = arith.addf %351, %356 : vector<14x128xf32>
    %c0_450 = arith.constant 0 : index
    %c12_451 = arith.constant 12 : index
    %c1_452 = arith.constant 1 : index
    %c0_453 = arith.constant 0 : index
    %358 = vector.load %arg1[%c0_450, %c12_451, %c1_452, %c0_453] : memref<1x16x16x8xf32, #tpu.memory_space<vmem>>, vector<1x1x14x8xf32>
    %359 = vector.shape_cast %358 : vector<1x1x14x8xf32> to vector<14x8xf32>
    %c7_454 = arith.constant 7 : index
    %c0_455 = arith.constant 0 : index
    %c0_456 = arith.constant 0 : index
    %360 = vector.load %arg2[%c7_454, %c0_455, %c0_456] : memref<9x8x128xf32, #tpu.memory_space<vmem>>, vector<1x8x128xf32>
    %361 = vector.shape_cast %360 : vector<1x8x128xf32> to vector<8x128xf32>
    %cst_457 = arith.constant dense<0.000000e+00> : vector<14x128xf32>
    %362 = tpu.matmul %359, %361, %cst_457 {dimension_numbers = #tpu.dot_dimension_numbers<[1], [0], [0], [1], [0, 0, 1, 1], [], []>} : vector<14x8xf32>, vector<8x128xf32>, vector<14x128xf32> -> vector<14x128xf32>
    %363 = arith.addf %357, %362 : vector<14x128xf32>
    %c0_458 = arith.constant 0 : index
    %c12_459 = arith.constant 12 : index
    %c2_460 = arith.constant 2 : index
    %c0_461 = arith.constant 0 : index
    %364 = vector.load %arg1[%c0_458, %c12_459, %c2_460, %c0_461] : memref<1x16x16x8xf32, #tpu.memory_space<vmem>>, vector<1x1x14x8xf32>
    %365 = vector.shape_cast %364 : vector<1x1x14x8xf32> to vector<14x8xf32>
    %c8_462 = arith.constant 8 : index
    %c0_463 = arith.constant 0 : index
    %c0_464 = arith.constant 0 : index
    %366 = vector.load %arg2[%c8_462, %c0_463, %c0_464] : memref<9x8x128xf32, #tpu.memory_space<vmem>>, vector<1x8x128xf32>
    %367 = vector.shape_cast %366 : vector<1x8x128xf32> to vector<8x128xf32>
    %cst_465 = arith.constant dense<0.000000e+00> : vector<14x128xf32>
    %368 = tpu.matmul %365, %367, %cst_465 {dimension_numbers = #tpu.dot_dimension_numbers<[1], [0], [0], [1], [0, 0, 1, 1], [], []>} : vector<14x8xf32>, vector<8x128xf32>, vector<14x128xf32> -> vector<14x128xf32>
    %369 = arith.addf %363, %368 : vector<14x128xf32>
    %c0_466 = arith.constant 0 : index
    %c0_467 = arith.constant 0 : index
    %370 = vector.load %arg5[%c0_466, %c0_467] : memref<14x128xf32, #tpu.memory_space<vmem>>, vector<14x128xf32>
    tpu.vector_store %arg5[%c0_466, %c0_467], %369 {strides = array<i32>} : memref<14x128xf32, #tpu.memory_space<vmem>>, vector<14x128xf32>,
    %c0_468 = arith.constant 0 : index
    %c0_469 = arith.constant 0 : index
    %371 = tpu.strided_load %arg5[%c0_468, %c0_469] {strides = array<i32: 2, 1>} : memref<14x128xf32, #tpu.memory_space<vmem>>, vector<7x128xf32>
    %c0_470 = arith.constant 0 : index
    %c0_471 = arith.constant 0 : index
    %372 = vector.load %arg3[%c0_470, %c0_471] : memref<1x128xf32, #tpu.memory_space<vmem>>, vector<1x128xf32>
    %373 = vector.broadcast %372 : vector<1x128xf32> to vector<7x128xf32>
    %374 = arith.addf %371, %373 : vector<7x128xf32>
    %cst_472 = arith.constant 0.000000e+00 : f32
    %375 = vector.broadcast %cst_472 : f32 to vector<7x128xf32>
    %376 = arith.maximumf %374, %375 : vector<7x128xf32>
    %c35 = arith.constant 35 : index
    %c0_473 = arith.constant 0 : index
    %377 = vector.load %arg6[%c35, %c0_473] : memref<49x128xf32, #tpu.memory_space<vmem>>, vector<7x128xf32>
    tpu.vector_store %arg6[%c35, %c0_473], %376 {strides = array<i32>} : memref<49x128xf32, #tpu.memory_space<vmem>>, vector<7x128xf32>,
    %cst_474 = arith.constant 0.000000e+00 : f32
    %378 = vector.broadcast %cst_474 : f32 to vector<14x128xf32>
    %c0_475 = arith.constant 0 : index
    %c12_476 = arith.constant 12 : index
    %c0_477 = arith.constant 0 : index
    %c0_478 = arith.constant 0 : index
    %379 = vector.load %arg1[%c0_475, %c12_476, %c0_477, %c0_478] : memref<1x16x16x8xf32, #tpu.memory_space<vmem>>, vector<1x1x14x8xf32>
    %380 = vector.shape_cast %379 : vector<1x1x14x8xf32> to vector<14x8xf32>
    %c0_479 = arith.constant 0 : index
    %c0_480 = arith.constant 0 : index
    %c0_481 = arith.constant 0 : index
    %381 = vector.load %arg2[%c0_479, %c0_480, %c0_481] : memref<9x8x128xf32, #tpu.memory_space<vmem>>, vector<1x8x128xf32>
    %382 = vector.shape_cast %381 : vector<1x8x128xf32> to vector<8x128xf32>
    %cst_482 = arith.constant dense<0.000000e+00> : vector<14x128xf32>
    %383 = tpu.matmul %380, %382, %cst_482 {dimension_numbers = #tpu.dot_dimension_numbers<[1], [0], [0], [1], [0, 0, 1, 1], [], []>} : vector<14x8xf32>, vector<8x128xf32>, vector<14x128xf32> -> vector<14x128xf32>
    %384 = arith.addf %378, %383 : vector<14x128xf32>
    %c0_483 = arith.constant 0 : index
    %c12_484 = arith.constant 12 : index
    %c1_485 = arith.constant 1 : index
    %c0_486 = arith.constant 0 : index
    %385 = vector.load %arg1[%c0_483, %c12_484, %c1_485, %c0_486] : memref<1x16x16x8xf32, #tpu.memory_space<vmem>>, vector<1x1x14x8xf32>
    %386 = vector.shape_cast %385 : vector<1x1x14x8xf32> to vector<14x8xf32>
    %c1_487 = arith.constant 1 : index
    %c0_488 = arith.constant 0 : index
    %c0_489 = arith.constant 0 : index
    %387 = vector.load %arg2[%c1_487, %c0_488, %c0_489] : memref<9x8x128xf32, #tpu.memory_space<vmem>>, vector<1x8x128xf32>
    %388 = vector.shape_cast %387 : vector<1x8x128xf32> to vector<8x128xf32>
    %cst_490 = arith.constant dense<0.000000e+00> : vector<14x128xf32>
    %389 = tpu.matmul %386, %388, %cst_490 {dimension_numbers = #tpu.dot_dimension_numbers<[1], [0], [0], [1], [0, 0, 1, 1], [], []>} : vector<14x8xf32>, vector<8x128xf32>, vector<14x128xf32> -> vector<14x128xf32>
    %390 = arith.addf %384, %389 : vector<14x128xf32>
    %c0_491 = arith.constant 0 : index
    %c12_492 = arith.constant 12 : index
    %c2_493 = arith.constant 2 : index
    %c0_494 = arith.constant 0 : index
    %391 = vector.load %arg1[%c0_491, %c12_492, %c2_493, %c0_494] : memref<1x16x16x8xf32, #tpu.memory_space<vmem>>, vector<1x1x14x8xf32>
    %392 = vector.shape_cast %391 : vector<1x1x14x8xf32> to vector<14x8xf32>
    %c2_495 = arith.constant 2 : index
    %c0_496 = arith.constant 0 : index
    %c0_497 = arith.constant 0 : index
    %393 = vector.load %arg2[%c2_495, %c0_496, %c0_497] : memref<9x8x128xf32, #tpu.memory_space<vmem>>, vector<1x8x128xf32>
    %394 = vector.shape_cast %393 : vector<1x8x128xf32> to vector<8x128xf32>
    %cst_498 = arith.constant dense<0.000000e+00> : vector<14x128xf32>
    %395 = tpu.matmul %392, %394, %cst_498 {dimension_numbers = #tpu.dot_dimension_numbers<[1], [0], [0], [1], [0, 0, 1, 1], [], []>} : vector<14x8xf32>, vector<8x128xf32>, vector<14x128xf32> -> vector<14x128xf32>
    %396 = arith.addf %390, %395 : vector<14x128xf32>
    %c0_499 = arith.constant 0 : index
    %c13 = arith.constant 13 : index
    %c0_500 = arith.constant 0 : index
    %c0_501 = arith.constant 0 : index
    %397 = vector.load %arg1[%c0_499, %c13, %c0_500, %c0_501] : memref<1x16x16x8xf32, #tpu.memory_space<vmem>>, vector<1x1x14x8xf32>
    %398 = vector.shape_cast %397 : vector<1x1x14x8xf32> to vector<14x8xf32>
    %c3_502 = arith.constant 3 : index
    %c0_503 = arith.constant 0 : index
    %c0_504 = arith.constant 0 : index
    %399 = vector.load %arg2[%c3_502, %c0_503, %c0_504] : memref<9x8x128xf32, #tpu.memory_space<vmem>>, vector<1x8x128xf32>
    %400 = vector.shape_cast %399 : vector<1x8x128xf32> to vector<8x128xf32>
    %cst_505 = arith.constant dense<0.000000e+00> : vector<14x128xf32>
    %401 = tpu.matmul %398, %400, %cst_505 {dimension_numbers = #tpu.dot_dimension_numbers<[1], [0], [0], [1], [0, 0, 1, 1], [], []>} : vector<14x8xf32>, vector<8x128xf32>, vector<14x128xf32> -> vector<14x128xf32>
    %402 = arith.addf %396, %401 : vector<14x128xf32>
    %c0_506 = arith.constant 0 : index
    %c13_507 = arith.constant 13 : index
    %c1_508 = arith.constant 1 : index
    %c0_509 = arith.constant 0 : index
    %403 = vector.load %arg1[%c0_506, %c13_507, %c1_508, %c0_509] : memref<1x16x16x8xf32, #tpu.memory_space<vmem>>, vector<1x1x14x8xf32>
    %404 = vector.shape_cast %403 : vector<1x1x14x8xf32> to vector<14x8xf32>
    %c4_510 = arith.constant 4 : index
    %c0_511 = arith.constant 0 : index
    %c0_512 = arith.constant 0 : index
    %405 = vector.load %arg2[%c4_510, %c0_511, %c0_512] : memref<9x8x128xf32, #tpu.memory_space<vmem>>, vector<1x8x128xf32>
    %406 = vector.shape_cast %405 : vector<1x8x128xf32> to vector<8x128xf32>
    %cst_513 = arith.constant dense<0.000000e+00> : vector<14x128xf32>
    %407 = tpu.matmul %404, %406, %cst_513 {dimension_numbers = #tpu.dot_dimension_numbers<[1], [0], [0], [1], [0, 0, 1, 1], [], []>} : vector<14x8xf32>, vector<8x128xf32>, vector<14x128xf32> -> vector<14x128xf32>
    %408 = arith.addf %402, %407 : vector<14x128xf32>
    %c0_514 = arith.constant 0 : index
    %c13_515 = arith.constant 13 : index
    %c2_516 = arith.constant 2 : index
    %c0_517 = arith.constant 0 : index
    %409 = vector.load %arg1[%c0_514, %c13_515, %c2_516, %c0_517] : memref<1x16x16x8xf32, #tpu.memory_space<vmem>>, vector<1x1x14x8xf32>
    %410 = vector.shape_cast %409 : vector<1x1x14x8xf32> to vector<14x8xf32>
    %c5_518 = arith.constant 5 : index
    %c0_519 = arith.constant 0 : index
    %c0_520 = arith.constant 0 : index
    %411 = vector.load %arg2[%c5_518, %c0_519, %c0_520] : memref<9x8x128xf32, #tpu.memory_space<vmem>>, vector<1x8x128xf32>
    %412 = vector.shape_cast %411 : vector<1x8x128xf32> to vector<8x128xf32>
    %cst_521 = arith.constant dense<0.000000e+00> : vector<14x128xf32>
    %413 = tpu.matmul %410, %412, %cst_521 {dimension_numbers = #tpu.dot_dimension_numbers<[1], [0], [0], [1], [0, 0, 1, 1], [], []>} : vector<14x8xf32>, vector<8x128xf32>, vector<14x128xf32> -> vector<14x128xf32>
    %414 = arith.addf %408, %413 : vector<14x128xf32>
    %c0_522 = arith.constant 0 : index
    %c14_523 = arith.constant 14 : index
    %c0_524 = arith.constant 0 : index
    %c0_525 = arith.constant 0 : index
    %415 = vector.load %arg1[%c0_522, %c14_523, %c0_524, %c0_525] : memref<1x16x16x8xf32, #tpu.memory_space<vmem>>, vector<1x1x14x8xf32>
    %416 = vector.shape_cast %415 : vector<1x1x14x8xf32> to vector<14x8xf32>
    %c6_526 = arith.constant 6 : index
    %c0_527 = arith.constant 0 : index
    %c0_528 = arith.constant 0 : index
    %417 = vector.load %arg2[%c6_526, %c0_527, %c0_528] : memref<9x8x128xf32, #tpu.memory_space<vmem>>, vector<1x8x128xf32>
    %418 = vector.shape_cast %417 : vector<1x8x128xf32> to vector<8x128xf32>
    %cst_529 = arith.constant dense<0.000000e+00> : vector<14x128xf32>
    %419 = tpu.matmul %416, %418, %cst_529 {dimension_numbers = #tpu.dot_dimension_numbers<[1], [0], [0], [1], [0, 0, 1, 1], [], []>} : vector<14x8xf32>, vector<8x128xf32>, vector<14x128xf32> -> vector<14x128xf32>
    %420 = arith.addf %414, %419 : vector<14x128xf32>
    %c0_530 = arith.constant 0 : index
    %c14_531 = arith.constant 14 : index
    %c1_532 = arith.constant 1 : index
    %c0_533 = arith.constant 0 : index
    %421 = vector.load %arg1[%c0_530, %c14_531, %c1_532, %c0_533] : memref<1x16x16x8xf32, #tpu.memory_space<vmem>>, vector<1x1x14x8xf32>
    %422 = vector.shape_cast %421 : vector<1x1x14x8xf32> to vector<14x8xf32>
    %c7_534 = arith.constant 7 : index
    %c0_535 = arith.constant 0 : index
    %c0_536 = arith.constant 0 : index
    %423 = vector.load %arg2[%c7_534, %c0_535, %c0_536] : memref<9x8x128xf32, #tpu.memory_space<vmem>>, vector<1x8x128xf32>
    %424 = vector.shape_cast %423 : vector<1x8x128xf32> to vector<8x128xf32>
    %cst_537 = arith.constant dense<0.000000e+00> : vector<14x128xf32>
    %425 = tpu.matmul %422, %424, %cst_537 {dimension_numbers = #tpu.dot_dimension_numbers<[1], [0], [0], [1], [0, 0, 1, 1], [], []>} : vector<14x8xf32>, vector<8x128xf32>, vector<14x128xf32> -> vector<14x128xf32>
    %426 = arith.addf %420, %425 : vector<14x128xf32>
    %c0_538 = arith.constant 0 : index
    %c14_539 = arith.constant 14 : index
    %c2_540 = arith.constant 2 : index
    %c0_541 = arith.constant 0 : index
    %427 = vector.load %arg1[%c0_538, %c14_539, %c2_540, %c0_541] : memref<1x16x16x8xf32, #tpu.memory_space<vmem>>, vector<1x1x14x8xf32>
    %428 = vector.shape_cast %427 : vector<1x1x14x8xf32> to vector<14x8xf32>
    %c8_542 = arith.constant 8 : index
    %c0_543 = arith.constant 0 : index
    %c0_544 = arith.constant 0 : index
    %429 = vector.load %arg2[%c8_542, %c0_543, %c0_544] : memref<9x8x128xf32, #tpu.memory_space<vmem>>, vector<1x8x128xf32>
    %430 = vector.shape_cast %429 : vector<1x8x128xf32> to vector<8x128xf32>
    %cst_545 = arith.constant dense<0.000000e+00> : vector<14x128xf32>
    %431 = tpu.matmul %428, %430, %cst_545 {dimension_numbers = #tpu.dot_dimension_numbers<[1], [0], [0], [1], [0, 0, 1, 1], [], []>} : vector<14x8xf32>, vector<8x128xf32>, vector<14x128xf32> -> vector<14x128xf32>
    %432 = arith.addf %426, %431 : vector<14x128xf32>
    %c0_546 = arith.constant 0 : index
    %c0_547 = arith.constant 0 : index
    %433 = vector.load %arg5[%c0_546, %c0_547] : memref<14x128xf32, #tpu.memory_space<vmem>>, vector<14x128xf32>
    tpu.vector_store %arg5[%c0_546, %c0_547], %432 {strides = array<i32>} : memref<14x128xf32, #tpu.memory_space<vmem>>, vector<14x128xf32>,
    %c0_548 = arith.constant 0 : index
    %c0_549 = arith.constant 0 : index
    %434 = tpu.strided_load %arg5[%c0_548, %c0_549] {strides = array<i32: 2, 1>} : memref<14x128xf32, #tpu.memory_space<vmem>>, vector<7x128xf32>
    %c0_550 = arith.constant 0 : index
    %c0_551 = arith.constant 0 : index
    %435 = vector.load %arg3[%c0_550, %c0_551] : memref<1x128xf32, #tpu.memory_space<vmem>>, vector<1x128xf32>
    %436 = vector.broadcast %435 : vector<1x128xf32> to vector<7x128xf32>
    %437 = arith.addf %434, %436 : vector<7x128xf32>
    %cst_552 = arith.constant 0.000000e+00 : f32
    %438 = vector.broadcast %cst_552 : f32 to vector<7x128xf32>
    %439 = arith.maximumf %437, %438 : vector<7x128xf32>
    %c42 = arith.constant 42 : index
    %c0_553 = arith.constant 0 : index
    %440 = vector.load %arg6[%c42, %c0_553] : memref<49x128xf32, #tpu.memory_space<vmem>>, vector<7x128xf32>
    tpu.vector_store %arg6[%c42, %c0_553], %439 {strides = array<i32>} : memref<49x128xf32, #tpu.memory_space<vmem>>, vector<7x128xf32>,
    %c0_554 = arith.constant 0 : index
    %c0_555 = arith.constant 0 : index
    %441 = vector.load %arg6[%c0_554, %c0_555] : memref<49x128xf32, #tpu.memory_space<vmem>>, vector<49x128xf32>
    %442 = arith.truncf %441 : vector<49x128xf32> to vector<49x128xbf16>
    %c0_556 = arith.constant 0 : index
    %c0_557 = arith.constant 0 : index
    %c0_558 = arith.constant 0 : index
    %443 = vector.load %arg4[%c0_556, %c0_557, %c0_558] : memref<1x49x128xbf16, #tpu.memory_space<vmem>>, vector<1x49x128xbf16>
    %444 = vector.shape_cast %443 : vector<1x49x128xbf16> to vector<49x128xbf16>
    %445 = vector.shape_cast %442 : vector<49x128xbf16> to vector<1x49x128xbf16>
    tpu.vector_store %arg4[%c0_556, %c0_557, %c0_558], %445 {strides = array<i32>} : memref<1x49x128xbf16, #tpu.memory_space<vmem>>, vector<1x49x128xbf16>,
    return
  }
  func.func @transform_0(%arg0: i32) -> (i32, i32, i32, i32) {
    %c0_i32 = arith.constant 0 : i32
    %c0_i32_0 = arith.constant 0 : i32
    %c0_i32_1 = arith.constant 0 : i32
    %c0_i32_2 = arith.constant 0 : i32
    return %arg0, %c0_i32, %c0_i32_0, %c0_i32_1 : i32, i32, i32, i32
  }
  func.func @transform_1(%arg0: i32) -> (i32, i32, i32) {
    %c0_i32 = arith.constant 0 : i32
    %c0_i32_0 = arith.constant 0 : i32
    %c0_i32_1 = arith.constant 0 : i32
    %c0_i32_2 = arith.constant 0 : i32
    return %c0_i32, %c0_i32_0, %c0_i32_1 : i32, i32, i32
  }
  func.func @transform_2(%arg0: i32) -> (i32, i32) {
    %c0_i32 = arith.constant 0 : i32
    %c0_i32_0 = arith.constant 0 : i32
    %c0_i32_1 = arith.constant 0 : i32
    return %c0_i32, %c0_i32_0 : i32, i32
  }
  func.func @transform_3(%arg0: i32) -> (i32, i32, i32) {
    %c0_i32 = arith.constant 0 : i32
    %c0_i32_0 = arith.constant 0 : i32
    %c0_i32_1 = arith.constant 0 : i32
    return %arg0, %c0_i32, %c0_i32_0 : i32, i32, i32
  }
}

</mosaic_0001>

<bundles_post_ra>
// kernel: tpu_custom_call.1
= control target key start
LH: loop header
LB: loop body
LE: loop exit
PB: predicated region body
PF: predicated region fallthrough
CT: control target
= control target key end

     0   :  { %s6782_s12 = smov 0   ;;  %s7232_s0 = inlined_call_operand.vmem [shape: f32[2,16,16,8], index: 0, kind: input, shape index: {}]   ;;  %s7233_s1 = inlined_call_operand.vmem [shape: f32[9,8,128], index: 1, kind: input, shape index: {}]   ;;  %s7234_s2 = inlined_call_operand.vmem [shape: f32[1,128], index: 2, kind: input, shape index: {}]   ;;  %s7235_s3 = inlined_call_operand.vmem [shape: bf16[2,49,128], index: 3, kind: output, shape index: {}]  }
   0x1 LB: > { %s5778_s13 = sadd.s32 4294967295, %s6760_s12   ;;  %p5782_p0 = scmp.ge.s32.totalorder %s6760_s12, 1  ;;  %s6760_s12 = sphi %s6782_s12, %s13_s12  }
   0x2   : > { %p137_p1 = scmp.lt.s32.totalorder %s6760_s12, 3 }
   0x4   : > { %p138_p2 = pnand %p5782_p0, %p137_p1 }
   0x5   : > { %v6793_v0 = vld [vmem:[%s7233_s1 + $0x8] sm:$0xff] (!%p138_p2)  ;;  %v6798_v1 = vld [vmem:[%s7233_s1 + $0x20] sm:$0xff] (!%p138_p2)  ;;  %p161_p3 = scmp.lt.s32.totalorder (!%p138_p2), %s5778_s13, 1  ;;  %vm178_vm0 = vcmask (!%p138_p2), 64512   ;;  %v6834_v9 = vld [vmem:[%s7233_s1 + $0x10] sm:$0xff] (!%p138_p2)  ;;  %vm5717_vm1 = vcmask (!%p138_p2), 1040384  }
   0x6   : > { %141 = sbr.rel (%p138_p2) target bundleno = 491 (0x1eb), region = 32  ;;  %v6803_v2 = vld [vmem:[%s7233_s1] sm:$0xff] (!%p138_p2)  ;;  %6318 = vmatprep.subr.mxu1 (!%p138_p2), %v6793_v0  ;;  %6338 = vmatprep.subr.mxu0 (!%p138_p2), %v6798_v1  ;;  %v6810_v3 = vld [vmem:[%s7233_s1 + $0x28] sm:$0xff] (!%p138_p2)  ;;  %v6842_v11 = vld [vmem:[%s7233_s1 + $0x30] sm:$0xff] (!%p138_p2)  ;;  %vm5718_vm2 = vsmask.f32 (!%p138_p2), 256 }
   0x7   : > { %6319 = vmatpush3.msra.mxu1 (!%p138_p2), %v6793_v0  ;;  %6339 = vmatpush3.msra.mxu0 (!%p138_p2), %v6798_v1  ;;  %v6856_v15 = vld [vmem:[%s7233_s1 + $0x18] sm:$0xff] (!%p138_p2)  ;;  %v6881_v22 = vld [vmem:[%s7233_s1 + $0x40] sm:$0xff] (!%p138_p2)  ;;  %vm5719_vm3 = vmand (!%p138_p2), %vm5717_vm1, %vm5718_vm2 }
   0x8   : > { %6323 = vmatprep.subr.mxu1 (!%p138_p2), %v6803_v2  ;;  %6343 = vmatprep.subr.mxu0 (!%p138_p2), %v6810_v3  ;;  %v6864_v17 = vld [vmem:[%s7233_s1 + $0x38] sm:$0xff] (!%p138_p2) }
   0xd   : > { %s7237_s13 = smov (!%p161_p3, %s5778_s13), 1 }
   0xe   : > { %s6104_s22 = sshll.u32 %s7237_s13, 8  ;;  %s6745_s11 = smul.u32 28, %s7237_s13 }
   0xf   : > { %s6822_s25 = scalar_lea.vmem %s7232_s0, %s6104_s22 }
  0x10   : > { %v174_v4 = vld [vmem:[%s6822_s25 + $0x1] sm:$0xff]  ;;  %v5799_v5 = vld [vmem:[%s6822_s25 + $0x11] sm:$0xff]  ;;  %v175_v6 = vld [vmem:[%s6822_s25 + $0x9] sm:$0x3f]  ;;  %s7222_s16 = scalar_lea.vmem %s7235_s3, %s6745_s11 }
  0x11   : > { %6320 = vmatprep.mubr.msk.f32.mxu1 %vm178_vm0, %v174_v4  ;;  %6340 = vmatprep.mubr.msk.f32.mxu0 %vm178_vm0, %v5799_v5  ;;  %v5800_v7 = vld [vmem:[%s6822_s25 + $0x19] sm:$0x3f]  ;;  %v171_v8 = vld [vmem:[%s6822_s25] sm:$0xff]  ;;  %v172_v12 = vld [vmem:[%s6822_s25 + $0x8] sm:$0x3f] }
  0x12   : > { %6321 = vmatmul.mubr.msk.f32.vlgmr.msra.gmra.mrb[0].mxu1 %vm178_vm0, %v175_v6  ;;  %6341 = vmatmul.mubr.msk.f32.vlgmr.msra.gmra.mrb[0].mxu0 %vm178_vm0, %v5800_v7  ;;  %v5804_v10 = vld [vmem:[%s6822_s25 + $0x12] sm:$0xff]  ;;  %v5805_v13 = vld [vmem:[%s6822_s25 + $0x1a] sm:$0x3f]  ;;  %v341_v14 = vld [vmem:[%s6822_s25 + $0x2] sm:$0xff] }
  0x13   : > { %6324 = vmatpush3.msra.mxu1 %v6803_v2  ;;  %6344 = vmatpush3.msra.mxu0 %v6810_v3  ;;  %v5809_v16 = vld [vmem:[%s6822_s25 + $0x20] sm:$0xff]  ;;  %v342_v18 = vld [vmem:[%s6822_s25 + $0xa] sm:$0x3f]  ;;  %v5794_v20 = vld [vmem:[%s6822_s25 + $0x10] sm:$0xff] }
  0x14   : > { %6325 = vmatprep.mubr.msk.f32.mxu1 %vm178_vm0, %v171_v8  ;;  %6328 = vmatprep.subr.mxu1 %v6834_v9  ;;  %v5810_v19 = vld [vmem:[%s6822_s25 + $0x28] sm:$0x3f]  ;;  %v5795_v23 = vld [vmem:[%s6822_s25 + $0x18] sm:$0x3f]  ;;  %v5870_v31 = vld [vmem:[%s6822_s25 + $0x40] sm:$0xff] }
  0x15   : > { %6345 = vmatprep.mubr.msk.f32.mxu0 %vm178_vm0, %v5804_v10  ;;  %6348 = vmatprep.subr.mxu0 %v6842_v11  ;;  %v5814_v21 = vld [vmem:[%s6822_s25 + $0x21] sm:$0xff]  ;;  %v5815_v24 = vld [vmem:[%s6822_s25 + $0x29] sm:$0x3f]  ;;  %v5839_v34 = vld [vmem:[%s6822_s25 + $0x30] sm:$0xff] }
  0x16   : > { %v5819_v25 = vld [vmem:[%s6822_s25 + $0x22] sm:$0xff]  ;;  %v5820_v27 = vld [vmem:[%s6822_s25 + $0x2a] sm:$0x3f]  ;;  %v5840_v36 = vld [vmem:[%s6822_s25 + $0x38] sm:$0x3f] }
  0x17   : > { %v5828_v26 = vld [vmem:[%s6822_s25 + $0x29] sm:$0x3f]  ;;  %v6907_v28 = vld [vmem:[%s6822_s25 + $0x41] sm:$0xff]  ;;  %v5844_v38 = vld [vmem:[%s6822_s25 + $0x31] sm:$0xff] }
  0x18   : > { %v5826_v29 = vld [vmem:[%s6822_s25 + $0x28] sm:$0x3f]  ;;  %v5884_v39 = vld [vmem:[%s6822_s25 + $0x50] sm:$0xff]  ;;  %v5845_v40 = vld [vmem:[%s6822_s25 + $0x39] sm:$0x3f] }
  0x19   : > { %v5873_v30 = vld [vmem:[%s6822_s25 + $0x49] sm:$0x3f]  ;;  %v5885_v41 = vld [vmem:[%s6822_s25 + $0x58] sm:$0x3f]  ;;  %v5899_v49 = vld [vmem:[%s6822_s25 + $0x60] sm:$0xff] }
  0x1a   : > { %6326 = vmatmul.mubr.msk.f32.vlgmr.msra.gmra.mrb[0].mxu1 %vm178_vm0, %v172_v12  ;;  %6346 = vmatmul.mubr.msk.f32.vlgmr.msra.gmra.mrb[0].mxu0 %vm178_vm0, %v5805_v13  ;;  %v5835_v32 = vld [vmem:[%s6822_s25 + $0x2a] sm:$0x3f]  ;;  %v5879_v35 = vld [vmem:[%s6822_s25 + $0x42] sm:$0xff]  ;;  %v5849_v42 = vld [vmem:[%s6822_s25 + $0x32] sm:$0xff] }
  0x1b   : > { %6329 = vmatpush3.msra.mxu1 %v6834_v9  ;;  %6349 = vmatpush3.msra.mxu0 %v6842_v11  ;;  %v5871_v33 = vld [vmem:[%s6822_s25 + $0x48] sm:$0x3f]  ;;  %v5889_v43 = vld [vmem:[%s6822_s25 + $0x51] sm:$0xff]  ;;  %v5850_v44 = vld [vmem:[%s6822_s25 + $0x3a] sm:$0x3f] }
  0x1c   : > { %6330 = vmatprep.mubr.msk.f32.mxu1 %vm178_vm0, %v341_v14  ;;  %6333 = vmatprep.subr.mxu1 %v6856_v15  ;;  %v5880_v37 = vld [vmem:[%s6822_s25 + $0x4a] sm:$0x3f]  ;;  %v5890_v45 = vld [vmem:[%s6822_s25 + $0x59] sm:$0x3f]  ;;  %v5904_v52 = vld [vmem:[%s6822_s25 + $0x61] sm:$0xff] }
  0x1d   : > { %6350 = vmatprep.mubr.msk.f32.mxu0 %vm178_vm0, %v5809_v16  ;;  %6353 = vmatprep.subr.mxu0 %v6864_v17  ;;  %v5894_v46 = vld [vmem:[%s6822_s25 + $0x52] sm:$0xff]  ;;  %v5855_v47 = vld [vmem:[%s6822_s25 + $0x48] sm:$0x3f]  ;;  %v5895_v48 = vld [vmem:[%s6822_s25 + $0x5a] sm:$0x3f] }
  0x1e   : > { %v5860_v50 = vld [vmem:[%s6822_s25 + $0x49] sm:$0x3f]  ;;  %v7013_v58 = vld [vmem:[%s6822_s25 + $0x81] sm:$0xff]  ;;  %v5929_v4 = vld [vmem:[%s6822_s25 + $0x70] sm:$0xff] }
  0x1f   : > { %v5900_v51 = vld [vmem:[%s6822_s25 + $0x68] sm:$0x3f]  ;;  %v5960_v61 = vld [vmem:[%s6822_s25 + $0x80] sm:$0xff]  ;;  %v5930_v6 = vld [vmem:[%s6822_s25 + $0x78] sm:$0x3f] }
  0x20   : > { %v5865_v53 = vld [vmem:[%s6822_s25 + $0x4a] sm:$0x3f]  ;;  %v5909_v55 = vld [vmem:[%s6822_s25 + $0x62] sm:$0xff]  ;;  %v5934_v8 = vld [vmem:[%s6822_s25 + $0x71] sm:$0xff] }
  0x21   : > { %v5905_v54 = vld [vmem:[%s6822_s25 + $0x69] sm:$0x3f]  ;;  %v5974_v10 = vld [vmem:[%s6822_s25 + $0x90] sm:$0xff]  ;;  %v5935_v12 = vld [vmem:[%s6822_s25 + $0x79] sm:$0x3f] }
  0x22   : > { %6331 = vmatmul.mubr.msk.f32.vlgmr.msra.gmra.mrb[0].mxu1 %vm178_vm0, %v342_v18  ;;  %6351 = vmatmul.mubr.msk.f32.vlgmr.msra.gmra.mrb[0].mxu0 %vm178_vm0, %v5810_v19  ;;  %v5918_v56 = vld [vmem:[%s6822_s25 + $0x69] sm:$0x3f]  ;;  %v5975_v13 = vld [vmem:[%s6822_s25 + $0x98] sm:$0x3f] }
  0x23   : > { %6334 = vmatpush3.msra.mxu1 %v6856_v15  ;;  %6354 = vmatpush3.msra.mxu0 %v6864_v17  ;;  %v5910_v57 = vld [vmem:[%s6822_s25 + $0x6a] sm:$0x3f]  ;;  %v5969_v5 = vld [vmem:[%s6822_s25 + $0x82] sm:$0xff]  ;;  %v5939_v14 = vld [vmem:[%s6822_s25 + $0x72] sm:$0xff] }
  0x24   : > { %6335 = vmatprep.mubr.msk.f32.mxu1 %vm178_vm0, %v5794_v20  ;;  %6355 = vmatprep.mubr.msk.f32.mxu0 %vm178_vm0, %v5814_v21  ;;  %v5916_v59 = vld [vmem:[%s6822_s25 + $0x68] sm:$0x3f]  ;;  %v5940_v18 = vld [vmem:[%s6822_s25 + $0x7a] sm:$0x3f]  ;;  %v5984_v20 = vld [vmem:[%s6822_s25 + $0x92] sm:$0xff] }
  0x25   : > { %6358 = vmatprep.subr.mxu0 %v6881_v22  ;;  %6363 = vmatprep.subr.mxu1 %v6793_v0  ;;  %v5963_v60 = vld [vmem:[%s6822_s25 + $0x89] sm:$0x3f]  ;;  %v5980_v19 = vld [vmem:[%s6822_s25 + $0x99] sm:$0x3f] }
  0x26   : > { %v5925_v62 = vld [vmem:[%s6822_s25 + $0x6a] sm:$0x3f] }
  0x27   : > { %v5961_v63 = vld [vmem:[%s6822_s25 + $0x88] sm:$0x3f] }
  0x28   : > { %v5970_v7 = vld [vmem:[%s6822_s25 + $0x8a] sm:$0x3f] }
  0x2a   : > { %6336 = vmatmul.mubr.msk.f32.vlgmr.msra.gmra.mrb[0].mxu1 %vm178_vm0, %v5795_v23  ;;  %6356 = vmatmul.mubr.msk.f32.vlgmr.msra.gmra.mrb[0].mxu0 %vm178_vm0, %v5815_v24  ;;  %v5985_v23 = vld [vmem:[%s6822_s25 + $0x9a] sm:$0x3f]  ;;  %v5989_v24 = vld [vmem:[%s6822_s25 + $0xa0] sm:$0xff] }
  0x2b   : > { %6359 = vmatpush3.msra.mxu0 %v6881_v22  ;;  %6364 = vmatpush3.msra.mxu1 %v6793_v0 }
  0x2c   : > { %6365 = vmatprep.mubr.msk.f32.mxu1 %vm178_vm0, %v5814_v21  ;;  %6368 = vmatprep.subr.mxu1 %v6803_v2  ;;  %v5945_v21 = vld [vmem:[%s6822_s25 + $0x88] sm:$0x3f] }
  0x2d   : > { %6360 = vmatprep.mubr.msk.f32.mxu0 %vm178_vm0, %v5819_v25  ;;  %6408 = vmatprep.subr.mxu0 %v6793_v0 }
  0x2e   : > { %6366 = vmatmul.mubr.msk.f32.vlgmr.msra.gmra.mrb[2].mxu1 %vm178_vm0, %v5828_v26  ;;  %v5990_v26 = vld [vmem:[%s6822_s25 + $0xa8] sm:$0x3f] }
  0x2f   : > { %6369 = vmatpush3.msra.mxu1 %v6803_v2  ;;  %6370 = vmatprep.mubr.msk.f32.mxu1 %vm178_vm0, %v5809_v16  ;;  %v5979_v16 = vld [vmem:[%s6822_s25 + $0x91] sm:$0xff] }
  0x30   : > { %6373 = vmatprep.subr.mxu1 %v6834_v9 }
  0x32   : > { %6361 = vmatmul.mubr.msk.f32.vlgmr.msra.gmra.mrb[0].mxu0 %vm178_vm0, %v5820_v27  ;;  %v5994_v27 = vld [vmem:[%s6822_s25 + $0xa1] sm:$0xff] }
  0x33   : > { %6409 = vmatpush3.msra.mxu0 %v6793_v0  ;;  %6410 = vmatprep.mubr.msk.f32.mxu0 %vm178_vm0, %v6907_v28 }
  0x34   : > { %6413 = vmatprep.subr.mxu0 %v6803_v2 }
  0x36   : > { %6371 = vmatmul.mubr.msk.f32.vlgmr.msra.gmra.mrb[2].mxu1 %vm178_vm0, %v5826_v29  ;;  %6411 = vmatmul.mubr.msk.f32.vlgmr.msra.gmra.mrb[2].mxu0 %vm178_vm0, %v5873_v30  ;;  %v5995_v29 = vld [vmem:[%s6822_s25 + $0xa9] sm:$0x3f] }
  0x37   : > { %6374 = vmatpush3.msra.mxu1 %v6834_v9  ;;  %6414 = vmatpush3.msra.mxu0 %v6803_v2  ;;  %v5999_v30 = vld [vmem:[%s6822_s25 + $0xa2] sm:$0xff] }
  0x38   : > { %6375 = vmatprep.mubr.msk.f32.mxu1 %vm178_vm0, %v5819_v25  ;;  %6378 = vmatprep.subr.mxu1 %v6856_v15  ;;  %v5950_v25 = vld [vmem:[%s6822_s25 + $0x89] sm:$0x3f] }
  0x39   : > { %6415 = vmatprep.mubr.msk.f32.mxu0 %vm178_vm0, %v5870_v31  ;;  %6418 = vmatprep.subr.mxu0 %v6834_v9 }
  0x3e   : > { %6376 = vmatmul.mubr.msk.f32.vlgmr.msra.gmra.mrb[2].mxu1 %vm178_vm0, %v5835_v32  ;;  %6416 = vmatmul.mubr.msk.f32.vlgmr.msra.gmra.mrb[2].mxu0 %vm178_vm0, %v5871_v33  ;;  %v6000_v32 = vld [vmem:[%s6822_s25 + $0xaa] sm:$0x3f]  ;;  %v7119_v33 = vld [vmem:[%s6822_s25 + $0xc1] sm:$0xff] }
  0x3f   : > { %6379 = vmatpush3.msra.mxu1 %v6856_v15  ;;  %6419 = vmatpush3.msra.mxu0 %v6834_v9 }
  0x40   : > { %6380 = vmatprep.mubr.msk.f32.mxu1 %vm178_vm0, %v5839_v34  ;;  %6383 = vmatprep.subr.mxu1 %v6798_v1  ;;  %v6006_v34 = vld [vmem:[%s6822_s25 + $0xa8] sm:$0x3f] }
  0x41   : > { %6420 = vmatprep.mubr.msk.f32.mxu0 %vm178_vm0, %v5879_v35  ;;  %6423 = vmatprep.subr.mxu0 %v6856_v15 }
  0x46   : > { %6381 = vmatmul.mubr.msk.f32.vlgmr.msra.gmra.mrb[2].mxu1 %vm178_vm0, %v5840_v36  ;;  %6421 = vmatmul.mubr.msk.f32.vlgmr.msra.gmra.mrb[2].mxu0 %vm178_vm0, %v5880_v37  ;;  %v6050_v36 = vld [vmem:[%s6822_s25 + $0xc0] sm:$0xff]  ;;  %v6051_v37 = vld [vmem:[%s6822_s25 + $0xc8] sm:$0x3f] }
  0x47   : > { %6384 = vmatpush3.msra.mxu1 %v6798_v1  ;;  %6424 = vmatpush3.msra.mxu0 %v6856_v15 }
  0x48   : > { %6385 = vmatprep.mubr.msk.f32.mxu1 %vm178_vm0, %v5844_v38  ;;  %6388 = vmatprep.subr.mxu1 %v6810_v3  ;;  %v6019_v38 = vld [vmem:[%s6822_s25 + $0xb0] sm:$0xff] }
  0x49   : > { %6425 = vmatprep.mubr.msk.f32.mxu0 %vm178_vm0, %v5884_v39  ;;  %6428 = vmatprep.subr.mxu0 %v6798_v1  ;;  %v6020_v39 = vld [vmem:[%s6822_s25 + $0xb8] sm:$0x3f] }
  0x4e   : > { %6386 = vmatmul.mubr.msk.f32.vlgmr.msra.gmra.mrb[2].mxu1 %vm178_vm0, %v5845_v40  ;;  %6426 = vmatmul.mubr.msk.f32.vlgmr.msra.gmra.mrb[2].mxu0 %vm178_vm0, %v5885_v41  ;;  %v6060_v40 = vld [vmem:[%s6822_s25 + $0xca] sm:$0x3f]  ;;  %v6024_v41 = vld [vmem:[%s6822_s25 + $0xb1] sm:$0xff] }
  0x4f   : > { %6389 = vmatpush3.msra.mxu1 %v6810_v3  ;;  %6429 = vmatpush3.msra.mxu0 %v6798_v1 }
  0x50   : > { %6390 = vmatprep.mubr.msk.f32.mxu1 %vm178_vm0, %v5849_v42  ;;  %6393 = vmatprep.subr.mxu1 %v6842_v11  ;;  %v6025_v42 = vld [vmem:[%s6822_s25 + $0xb9] sm:$0x3f] }
  0x51   : > { %6430 = vmatprep.mubr.msk.f32.mxu0 %vm178_vm0, %v5889_v43  ;;  %6433 = vmatprep.subr.mxu0 %v6810_v3  ;;  %v6065_v43 = vld [vmem:[%s6822_s25 + $0xd8] sm:$0x3f] }
  0x56   : > { %6391 = vmatmul.mubr.msk.f32.vlgmr.msra.gmra.mrb[2].mxu1 %vm178_vm0, %v5850_v44  ;;  %6431 = vmatmul.mubr.msk.f32.vlgmr.msra.gmra.mrb[2].mxu0 %vm178_vm0, %v5890_v45  ;;  %v6029_v44 = vld [vmem:[%s6822_s25 + $0xb2] sm:$0xff] }
  0x57   : > { %6394 = vmatpush3.msra.mxu1 %v6842_v11  ;;  %6434 = vmatpush3.msra.mxu0 %v6810_v3  ;;  %v6069_v45 = vld [vmem:[%s6822_s25 + $0xd1] sm:$0xff] }
  0x58   : > { %6395 = vmatprep.mubr.msk.f32.mxu1 %vm178_vm0, %v5870_v31  ;;  %6398 = vmatprep.subr.mxu1 %v6864_v17  ;;  %v6008_v31 = vld [vmem:[%s6822_s25 + $0xa9] sm:$0x3f] }
  0x59   : > { %6435 = vmatprep.mubr.msk.f32.mxu0 %vm178_vm0, %v5894_v46  ;;  %6438 = vmatprep.subr.mxu0 %v6842_v11  ;;  %v6070_v46 = vld [vmem:[%s6822_s25 + $0xd9] sm:$0x3f] }
  0x5e   : > { %6396 = vmatmul.mubr.msk.f32.vlgmr.msra.gmra.mrb[2].mxu1 %vm178_vm0, %v5855_v47  ;;  %6436 = vmatmul.mubr.msk.f32.vlgmr.msra.gmra.mrb[2].mxu0 %vm178_vm0, %v5895_v48  ;;  %v6074_v47 = vld [vmem:[%s6822_s25 + $0xd2] sm:$0xff]  ;;  %v6075_v48 = vld [vmem:[%s6822_s25 + $0xda] sm:$0x3f] }
  0x5f   : > { %6399 = vmatpush3.msra.mxu1 %v6864_v17  ;;  %6439 = vmatpush3.msra.mxu0 %v6842_v11 }
  0x60   : > { %6400 = vmatprep.mubr.msk.f32.mxu1 %vm178_vm0, %v6907_v28  ;;  %6403 = vmatprep.subr.mxu1 %v6881_v22  ;;  %v5955_v28 = vld [vmem:[%s6822_s25 + $0x8a] sm:$0x3f] }
  0x61   : > { %6440 = vmatprep.mubr.msk.f32.mxu0 %vm178_vm0, %v5899_v49  ;;  %6443 = vmatprep.subr.mxu0 %v6864_v17 }
  0x66   : > { %6401 = vmatmul.mubr.msk.f32.vlgmr.msra.gmra.mrb[2].mxu1 %vm178_vm0, %v5860_v50  ;;  %6441 = vmatmul.mubr.msk.f32.vlgmr.msra.gmra.mrb[2].mxu0 %vm178_vm0, %v5900_v51  ;;  %v6080_v50 = vld [vmem:[%s6822_s25 + $0xe8] sm:$0x3f] }
  0x67   : > { %6404 = vmatpush3.msra.mxu1 %v6881_v22  ;;  %6444 = vmatpush3.msra.mxu0 %v6864_v17  ;;  %v6084_v51 = vld [vmem:[%s6822_s25 + $0xe1] sm:$0xff] }
  0x68   : > { %6405 = vmatprep.mubr.msk.f32.mxu1 %vm178_vm0, %v5879_v35  ;;  %6445 = vmatprep.mubr.msk.f32.mxu0 %vm178_vm0, %v5904_v52  ;;  %v6053_v35 = vld [vmem:[%s6822_s25 + $0xc9] sm:$0x3f] }
  0x69   : > { %6448 = vmatprep.subr.mxu0 %v6881_v22  ;;  %6453 = vmatprep.subr.mxu1 %v6793_v0 }
  0x6e   : > { %6406 = vmatmul.mubr.msk.f32.vlgmr.msra.gmra.mrb[2].mxu1 %vm178_vm0, %v5865_v53  ;;  %6446 = vmatmul.mubr.msk.f32.vlgmr.msra.gmra.mrb[2].mxu0 %vm178_vm0, %v5905_v54  ;;  %v6089_v53 = vld [vmem:[%s6822_s25 + $0xe2] sm:$0xff]  ;;  %v6090_v54 = vld [vmem:[%s6822_s25 + $0xea] sm:$0x3f] }
  0x6f   : > { %6449 = vmatpush3.msra.mxu0 %v6881_v22  ;;  %6454 = vmatpush3.msra.mxu1 %v6793_v0 }
  0x70   : > { %6455 = vmatprep.mubr.msk.f32.mxu1 %vm178_vm0, %v5904_v52  ;;  %6458 = vmatprep.subr.mxu1 %v6803_v2  ;;  %v6085_v52 = vld [vmem:[%s6822_s25 + $0xe9] sm:$0x3f] }
  0x71   : > { %6450 = vmatprep.mubr.msk.f32.mxu0 %vm178_vm0, %v5909_v55  ;;  %6498 = vmatprep.subr.mxu0 %v6793_v0 }
  0x72   : > { %6456 = vmatmul.mubr.msk.f32.vlgmr.msra.gmra.mrb[4].mxu1 %vm178_vm0, %v5918_v56 }
  0x73   : > { %6459 = vmatpush3.msra.mxu1 %v6803_v2  ;;  %6460 = vmatprep.mubr.msk.f32.mxu1 %vm178_vm0, %v5899_v49  ;;  %v6079_v49 = vld [vmem:[%s6822_s25 + $0xe0] sm:$0xff] }
  0x74   : > { %6463 = vmatprep.subr.mxu1 %v6834_v9 }
  0x76   : > { %6451 = vmatmul.mubr.msk.f32.vlgmr.msra.gmra.mrb[2].mxu0 %vm178_vm0, %v5910_v57 }
  0x77   : > { %6499 = vmatpush3.msra.mxu0 %v6793_v0  ;;  %6500 = vmatprep.mubr.msk.f32.mxu0 %vm178_vm0, %v7013_v58 }
  0x78   : > { %6503 = vmatprep.subr.mxu0 %v6803_v2 }
  0x7a   : > { %6461 = vmatmul.mubr.msk.f32.vlgmr.msra.gmra.mrb[4].mxu1 %vm178_vm0, %v5916_v59  ;;  %6501 = vmatmul.mubr.msk.f32.vlgmr.msra.gmra.mrb[4].mxu0 %vm178_vm0, %v5963_v60  ;;  %v5824_v60 = vld [vmem:[%s7234_s2] ss:$0 sm:$0xff] }
  0x7b   : > { %6464 = vmatpush3.msra.mxu1 %v6834_v9  ;;  %6504 = vmatpush3.msra.mxu0 %v6803_v2 }
  0x7c   : > { %6465 = vmatprep.mubr.msk.f32.mxu1 %vm178_vm0, %v5909_v55  ;;  %6468 = vmatprep.subr.mxu1 %v6856_v15 }
  0x7d   : > { %6505 = vmatprep.mubr.msk.f32.mxu0 %vm178_vm0, %v5960_v61  ;;  %6508 = vmatprep.subr.mxu0 %v6834_v9 }
  0x82   : > { %6466 = vmatmul.mubr.msk.f32.vlgmr.msra.gmra.mrb[4].mxu1 %vm178_vm0, %v5925_v62  ;;  %6506 = vmatmul.mubr.msk.f32.vlgmr.msra.gmra.mrb[4].mxu0 %vm178_vm0, %v5961_v63 }
  0x83   : > { %6469 = vmatpush3.msra.mxu1 %v6856_v15  ;;  %6509 = vmatpush3.msra.mxu0 %v6834_v9 }
  0x84   : > { %6470 = vmatprep.mubr.msk.f32.mxu1 %vm178_vm0, %v5929_v4  ;;  %6473 = vmatprep.subr.mxu1 %v6798_v1 }
  0x85   : > { %6510 = vmatprep.mubr.msk.f32.mxu0 %vm178_vm0, %v5969_v5  ;;  %6513 = vmatprep.subr.mxu0 %v6856_v15 }
  0x8a   : > { %6471 = vmatmul.mubr.msk.f32.vlgmr.msra.gmra.mrb[4].mxu1 %vm178_vm0, %v5930_v6  ;;  %6511 = vmatmul.mubr.msk.f32.vlgmr.msra.gmra.mrb[4].mxu0 %vm178_vm0, %v5970_v7 }
  0x8b   : > { %6474 = vmatpush3.msra.mxu1 %v6798_v1  ;;  %6514 = vmatpush3.msra.mxu0 %v6856_v15 }
  0x8c   : > { %6475 = vmatprep.mubr.msk.f32.mxu1 %vm178_vm0, %v5934_v8  ;;  %6478 = vmatprep.subr.mxu1 %v6810_v3 }
  0x8d   : > { %6515 = vmatprep.mubr.msk.f32.mxu0 %vm178_vm0, %v5974_v10  ;;  %6518 = vmatprep.subr.mxu0 %v6798_v1 }
  0x92   : > { %6476 = vmatmul.mubr.msk.f32.vlgmr.msra.gmra.mrb[4].mxu1 %vm178_vm0, %v5935_v12  ;;  %6516 = vmatmul.mubr.msk.f32.vlgmr.msra.gmra.mrb[4].mxu0 %vm178_vm0, %v5975_v13 }
  0x93   : > { %6479 = vmatpush3.msra.mxu1 %v6810_v3  ;;  %6519 = vmatpush3.msra.mxu0 %v6798_v1 }
  0x94   : > { %6480 = vmatprep.mubr.msk.f32.mxu1 %vm178_vm0, %v5939_v14  ;;  %6483 = vmatprep.subr.mxu1 %v6842_v11 }
  0x95   : > { %6520 = vmatprep.mubr.msk.f32.mxu0 %vm178_vm0, %v5979_v16  ;;  %6523 = vmatprep.subr.mxu0 %v6810_v3 }
  0x9a   : > { %6481 = vmatmul.mubr.msk.f32.vlgmr.msra.gmra.mrb[4].mxu1 %vm178_vm0, %v5940_v18  ;;  %6521 = vmatmul.mubr.msk.f32.vlgmr.msra.gmra.mrb[4].mxu0 %vm178_vm0, %v5980_v19 }
  0x9b   : > { %6484 = vmatpush3.msra.mxu1 %v6842_v11  ;;  %6524 = vmatpush3.msra.mxu0 %v6810_v3 }
  0x9c   : > { %6485 = vmatprep.mubr.msk.f32.mxu1 %vm178_vm0, %v5960_v61  ;;  %6488 = vmatprep.subr.mxu1 %v6864_v17 }
  0x9d   : > { %6525 = vmatprep.mubr.msk.f32.mxu0 %vm178_vm0, %v5984_v20  ;;  %6528 = vmatprep.subr.mxu0 %v6842_v11 }
  0xa2   : > { %6486 = vmatmul.mubr.msk.f32.vlgmr.msra.gmra.mrb[4].mxu1 %vm178_vm0, %v5945_v21  ;;  %6526 = vmatmul.mubr.msk.f32.vlgmr.msra.gmra.mrb[4].mxu0 %vm178_vm0, %v5985_v23 }
  0xa3   : > { %6489 = vmatpush3.msra.mxu1 %v6864_v17  ;;  %6529 = vmatpush3.msra.mxu0 %v6842_v11 }
  0xa4   : > { %6490 = vmatprep.mubr.msk.f32.mxu1 %vm178_vm0, %v7013_v58  ;;  %6493 = vmatprep.subr.mxu1 %v6881_v22 }
  0xa5   : > { %6530 = vmatprep.mubr.msk.f32.mxu0 %vm178_vm0, %v5989_v24  ;;  %6533 = vmatprep.subr.mxu0 %v6864_v17 }
  0xaa   : > { %6491 = vmatmul.mubr.msk.f32.vlgmr.msra.gmra.mrb[4].mxu1 %vm178_vm0, %v5950_v25  ;;  %6531 = vmatmul.mubr.msk.f32.vlgmr.msra.gmra.mrb[4].mxu0 %vm178_vm0, %v5990_v26 }
  0xab   : > { %6494 = vmatpush3.msra.mxu1 %v6881_v22  ;;  %6534 = vmatpush3.msra.mxu0 %v6864_v17 }
  0xac   : > { %6495 = vmatprep.mubr.msk.f32.mxu1 %vm178_vm0, %v5969_v5  ;;  %6535 = vmatprep.mubr.msk.f32.mxu0 %vm178_vm0, %v5994_v27 }
  0xad   : > { %6538 = vmatprep.subr.mxu0 %v6881_v22  ;;  %6543 = vmatprep.subr.mxu1 %v6793_v0 }
  0xb2   : > { %6496 = vmatmul.mubr.msk.f32.vlgmr.msra.gmra.mrb[4].mxu1 %vm178_vm0, %v5955_v28  ;;  %6536 = vmatmul.mubr.msk.f32.vlgmr.msra.gmra.mrb[4].mxu0 %vm178_vm0, %v5995_v29 }
  0xb3   : > { %6539 = vmatpush3.msra.mxu0 %v6881_v22  ;;  %6544 = vmatpush3.msra.mxu1 %v6793_v0 }
  0xb4   : > { %6545 = vmatprep.mubr.msk.f32.mxu1 %vm178_vm0, %v5994_v27  ;;  %6548 = vmatprep.subr.mxu1 %v6803_v2 }
  0xb5   : > { %6540 = vmatprep.mubr.msk.f32.mxu0 %vm178_vm0, %v5999_v30  ;;  %6588 = vmatprep.subr.mxu0 %v6793_v0 }
  0xb6   : > { %6546 = vmatmul.mubr.msk.f32.vlgmr.msra.gmra.mrb[6].mxu1 %vm178_vm0, %v6008_v31 }
  0xb7   : > { %6549 = vmatpush3.msra.mxu1 %v6803_v2  ;;  %6550 = vmatprep.mubr.msk.f32.mxu1 %vm178_vm0, %v5989_v24 }
  0xb8   : > { %6553 = vmatprep.subr.mxu1 %v6834_v9 }
  0xba   : > { %6541 = vmatmul.mubr.msk.f32.vlgmr.msra.gmra.mrb[4].mxu0 %vm178_vm0, %v6000_v32 }
  0xbb   : > { %6589 = vmatpush3.msra.mxu0 %v6793_v0  ;;  %6590 = vmatprep.mubr.msk.f32.mxu0 %vm178_vm0, %v7119_v33  ;;  %v6015_v0 = vld [vmem:[%s6822_s25 + $0xaa] sm:$0x3f] }
  0xbc   : > { %6593 = vmatprep.subr.mxu0 %v6803_v2 }
  0xbe   : > { %6551 = vmatmul.mubr.msk.f32.vlgmr.msra.gmra.mrb[6].mxu1 %vm178_vm0, %v6006_v34  ;;  %6591 = vmatmul.mubr.msk.f32.vlgmr.msra.gmra.mrb[6].mxu0 %vm178_vm0, %v6053_v35 }
  0xbf   : > { %6554 = vmatpush3.msra.mxu1 %v6834_v9  ;;  %6594 = vmatpush3.msra.mxu0 %v6803_v2  ;;  %v6059_v2 = vld [vmem:[%s6822_s25 + $0xc2] sm:$0xff] }
  0xc0   : > { %6555 = vmatprep.mubr.msk.f32.mxu1 %vm178_vm0, %v5999_v30  ;;  %6558 = vmatprep.subr.mxu1 %v6856_v15 }
  0xc1   : > { %6595 = vmatprep.mubr.msk.f32.mxu0 %vm178_vm0, %v6050_v36  ;;  %6598 = vmatprep.subr.mxu0 %v6834_v9 }
  0xc6   : > { %6556 = vmatmul.mubr.msk.f32.vlgmr.msra.gmra.mrb[6].mxu1 %vm178_vm0, %v6015_v0  ;;  %6596 = vmatmul.mubr.msk.f32.vlgmr.msra.gmra.mrb[6].mxu0 %vm178_vm0, %v6051_v37 }
  0xc7   : > { %6559 = vmatpush3.msra.mxu1 %v6856_v15  ;;  %6599 = vmatpush3.msra.mxu0 %v6834_v9  ;;  %v6064_v9 = vld [vmem:[%s6822_s25 + $0xd0] sm:$0xff] }
  0xc8   : > { %6560 = vmatprep.mubr.msk.f32.mxu1 %vm178_vm0, %v6019_v38  ;;  %6563 = vmatprep.subr.mxu1 %v6798_v1 }
  0xc9   : > { %6600 = vmatprep.mubr.msk.f32.mxu0 %vm178_vm0, %v6059_v2  ;;  %6603 = vmatprep.subr.mxu0 %v6856_v15 }
  0xce   : > { %6561 = vmatmul.mubr.msk.f32.vlgmr.msra.gmra.mrb[6].mxu1 %vm178_vm0, %v6020_v39  ;;  %6601 = vmatmul.mubr.msk.f32.vlgmr.msra.gmra.mrb[6].mxu0 %vm178_vm0, %v6060_v40 }
  0xcf   : > { %6564 = vmatpush3.msra.mxu1 %v6798_v1  ;;  %6604 = vmatpush3.msra.mxu0 %v6856_v15  ;;  %v6030_v15 = vld [vmem:[%s6822_s25 + $0xba] sm:$0x3f] }
  0xd0   : > { %6565 = vmatprep.mubr.msk.f32.mxu1 %vm178_vm0, %v6024_v41  ;;  %6568 = vmatprep.subr.mxu1 %v6810_v3 }
  0xd1   : > { %6605 = vmatprep.mubr.msk.f32.mxu0 %vm178_vm0, %v6064_v9  ;;  %6608 = vmatprep.subr.mxu0 %v6798_v1  ;;  %v5720_v9 = vld [vmem:[%s7222_s16 + $0x18] sm:$0x1] }
  0xd6   : > { %6566 = vmatmul.mubr.msk.f32.vlgmr.msra.gmra.mrb[6].mxu1 %vm178_vm0, %v6025_v42  ;;  %6606 = vmatmul.mubr.msk.f32.vlgmr.msra.gmra.mrb[6].mxu0 %vm178_vm0, %v6065_v43 }
  0xd7   : > { %6569 = vmatpush3.msra.mxu1 %v6810_v3  ;;  %6609 = vmatpush3.msra.mxu0 %v6798_v1  ;;  %v6035_v1 = vld [vmem:[%s6822_s25 + $0xc8] sm:$0x3f] }
  0xd8   : > { %6570 = vmatprep.mubr.msk.f32.mxu1 %vm178_vm0, %v6029_v44  ;;  %6573 = vmatprep.subr.mxu1 %v6842_v11 }
  0xd9   : > { %6610 = vmatprep.mubr.msk.f32.mxu0 %vm178_vm0, %v6069_v45  ;;  %6613 = vmatprep.subr.mxu0 %v6810_v3 }
  0xde   : > { %6571 = vmatmul.mubr.msk.f32.vlgmr.msra.gmra.mrb[6].mxu1 %vm178_vm0, %v6030_v15  ;;  %6611 = vmatmul.mubr.msk.f32.vlgmr.msra.gmra.mrb[6].mxu0 %vm178_vm0, %v6070_v46 }
  0xdf   : > { %6574 = vmatpush3.msra.mxu1 %v6842_v11  ;;  %6614 = vmatpush3.msra.mxu0 %v6810_v3  ;;  %v6040_v3 = vld [vmem:[%s6822_s25 + $0xc9] sm:$0x3f] }
  0xe0   : > { %6575 = vmatprep.mubr.msk.f32.mxu1 %vm178_vm0, %v6050_v36  ;;  %6578 = vmatprep.subr.mxu1 %v6864_v17 }
  0xe1   : > { %6615 = vmatprep.mubr.msk.f32.mxu0 %vm178_vm0, %v6074_v47  ;;  %6618 = vmatprep.subr.mxu0 %v6842_v11 }
  0xe6   : > { %6576 = vmatmul.mubr.msk.f32.vlgmr.msra.gmra.mrb[6].mxu1 %vm178_vm0, %v6035_v1  ;;  %6616 = vmatmul.mubr.msk.f32.vlgmr.msra.gmra.mrb[6].mxu0 %vm178_vm0, %v6075_v48 }
  0xe7   : > { %6579 = vmatpush3.msra.mxu1 %v6864_v17  ;;  %6619 = vmatpush3.msra.mxu0 %v6842_v11  ;;  %v6045_v11 = vld [vmem:[%s6822_s25 + $0xca] sm:$0x3f] }
  0xe8   : > { %6580 = vmatprep.mubr.msk.f32.mxu1 %vm178_vm0, %v7119_v33  ;;  %6583 = vmatprep.subr.mxu1 %v6881_v22 }
  0xe9   : > { %6620 = vmatprep.mubr.msk.f32.mxu0 %vm178_vm0, %v6079_v49  ;;  %6623 = vmatprep.subr.mxu0 %v6864_v17 }
  0xee   : > { %6581 = vmatmul.mubr.msk.f32.vlgmr.msra.gmra.mrb[6].mxu1 %vm178_vm0, %v6040_v3  ;;  %6621 = vmatmul.mubr.msk.f32.vlgmr.msra.gmra.mrb[6].mxu0 %vm178_vm0, %v6080_v50 }
  0xef   : > { %6584 = vmatpush3.msra.mxu1 %v6881_v22  ;;  %6624 = vmatpush3.msra.mxu0 %v6864_v17 }
  0xf0   : > { %6585 = vmatprep.mubr.msk.f32.mxu1 %vm178_vm0, %v6059_v2  ;;  %6625 = vmatprep.mubr.msk.f32.mxu0 %vm178_vm0, %v6084_v51 }
  0xf1   : > { %6628 = vmatprep.subr.mxu0 %v6881_v22 }
  0xf6   : > { %6586 = vmatmul.mubr.msk.f32.vlgmr.msra.gmra.mrb[6].mxu1 %vm178_vm0, %v6045_v11  ;;  %6626 = vmatmul.mubr.msk.f32.vlgmr.msra.gmra.mrb[6].mxu0 %vm178_vm0, %v6085_v52 }
  0xf7   : > { %6629 = vmatpush3.msra.mxu0 %v6881_v22  ;;  %6630 = vmatprep.mubr.msk.f32.mxu0 %vm178_vm0, %v6089_v53 }
  0xfd   : > { %v6337_v55 = vpop.f32.mrb[0].mxu1 }
  0xfe   : > { %v505_v17 = vpop.f32.mrb[1].mxu1  ;;  %6631 = vmatmul.mubr.msk.f32.vlgmr.msra.gmra.mrb[6].mxu0 %vm178_vm0, %v6090_v54 }
 0x105   : > { %v6362_v56 = vpop.f32.mrb[0].mxu0 }
 0x106   : > { %v6633_v57 = vadd.f32 %v6362_v56, %v6337_v55  ;;  %v941_v58 = vpop.f32.mrb[1].mxu0 }
 0x107   : > { %v6634_v59 = vadd.f32 %v941_v58, %v505_v17 }
 0x108   : > { %953 = vst [vmem:[#allocation2 + $0x8] sm:$0x3f] %v6633_v57 }
 0x109   : > { %952 = vst [vmem:[#allocation2] sm:$0xff] %v6634_v59 }
 0x110   : > { %v954_v61 = vld [vmem:[#allocation2] ss:$2 sm:$0x7f] }
 0x111   : > { %v962_v62 = vadd.f32 %v5824_v60, %v954_v61 }
 0x113   : > { %v963_v22 = vmax.f32 %v962_v62, 0.0 }
 0x115   : > { %964 = vst [vmem:[#allocation3] sm:$0x7f] %v963_v22 }
 0x141   : > { %v6407_v63 = vpop.f32.mrb[2].mxu1 }
 0x142   : > { %1738 = vst [vmem:[#allocation2 + $0x8] sm:$0x3f] %v6407_v63  ;;  %v1726_v4 = vpop.f32.mrb[3].mxu1 }
 0x143   : > { %1737 = vst [vmem:[#allocation2] sm:$0xff] %v1726_v4 }
 0x149   : > { %v6452_v5 = vpop.f32.mrb[2].mxu0 }
 0x14a   : > { %v1739_v6 = vld [vmem:[#allocation2] ss:$2 sm:$0x7f]  ;;  %v2511_v7 = vpop.f32.mrb[3].mxu0 }
 0x14b   : > { %v1747_v8 = vadd.f32 %v5824_v60, %v1739_v6  ;;  %2523 = vst [vmem:[#allocation2 + $0x8] sm:$0x3f] %v6452_v5  ;;  %2522 = vst [vmem:[#allocation2] sm:$0xff] %v2511_v7 }
 0x14d   : > { %v1748_v10 = vmax.f32 %v1747_v8, 0.0 }
 0x14f   : > { %1749 = vst [vmem:[#allocation3 + $0x7] sm:$0x7f] %v1748_v10 }
 0x152   : > { %v2524_v12 = vld [vmem:[#allocation2] ss:$2 sm:$0x7f] }
 0x153   : > { %v2532_v13 = vadd.f32 %v5824_v60, %v2524_v12 }
 0x155   : > { %v2533_v14 = vmax.f32 %v2532_v13, 0.0 }
 0x156   : > { %v5675_v16 = vld [vmem:[#allocation3] sm:$0xff] }
 0x157   : > { %2534 = vst [vmem:[#allocation3 + $0xe] sm:$0x7f] %v2533_v14 }
 0x15e   : > { %v5676_v18 = vld [vmem:[#allocation3 + $0x8] sm:$0xff] }
 0x15f   : > { %v6115_v19 = vpack.c.bf16 %v5676_v18, %v5675_v16 }
 0x161   : > { %6116 = vst [vmem:[%s7222_s16] sm:$0xff] %v6115_v19  }
 0x185   : > { %v6497_v20 = vpop.f32.mrb[4].mxu1 }
 0x186   : > { %3308 = vst [vmem:[#allocation2 + $0x8] sm:$0x3f] %v6497_v20  ;;  %v3296_v21 = vpop.f32.mrb[5].mxu1 }
 0x187   : > { %3307 = vst [vmem:[#allocation2] sm:$0xff] %v3296_v21 }
 0x18d   : > { %v6542_v23 = vpop.f32.mrb[4].mxu0 }
 0x18e   : > { %v3309_v24 = vld [vmem:[#allocation2] ss:$2 sm:$0x7f]  ;;  %v4081_v25 = vpop.f32.mrb[5].mxu0 }
 0x18f   : > { %v3317_v26 = vadd.f32 %v5824_v60, %v3309_v24  ;;  %4093 = vst [vmem:[#allocation2 + $0x8] sm:$0x3f] %v6542_v23  ;;  %4092 = vst [vmem:[#allocation2] sm:$0xff] %v4081_v25 }
 0x191   : > { %v3318_v27 = vmax.f32 %v3317_v26, 0.0 }
 0x193   : > { %3319 = vst [vmem:[#allocation3 + $0x15] sm:$0x7f] %v3318_v27 }
 0x196   : > { %v4094_v28 = vld [vmem:[#allocation2] ss:$2 sm:$0x7f] }
 0x197   : > { %v4102_v29 = vadd.f32 %v5824_v60, %v4094_v28 }
 0x199   : > { %v4103_v30 = vmax.f32 %v4102_v29, 0.0 }
 0x19a   : > { %v5677_v31 = vld [vmem:[#allocation3 + $0x10] sm:$0xff] }
 0x19b   : > { %4104 = vst [vmem:[#allocation3 + $0x1c] sm:$0x7f] %v4103_v30 }
 0x1a2   : > { %v5678_v32 = vld [vmem:[#allocation3 + $0x18] sm:$0xff] }
 0x1a3   : > { %v6120_v33 = vpack.c.bf16 %v5678_v32, %v5677_v31 }
 0x1a5   : > { %6127 = vst [vmem:[%s7222_s16 + $0x8] sm:$0xff] %v6120_v33  }
 0x1c9   : > { %v6587_v34 = vpop.f32.mrb[6].mxu1 }
 0x1ca   : > { %4878 = vst [vmem:[#allocation2 + $0x8] sm:$0x3f] %v6587_v34  ;;  %v4866_v35 = vpop.f32.mrb[7].mxu1 }
 0x1cb   : > { %4877 = vst [vmem:[#allocation2] sm:$0xff] %v4866_v35 }
 0x1d1   : > { %v6632_v36 = vpop.f32.mrb[6].mxu0 }
 0x1d2   : > { %v4879_v0 = vld [vmem:[#allocation2] ss:$2 sm:$0x7f]  ;;  %v5651_v37 = vpop.f32.mrb[7].mxu0 }
 0x1d3   : > { %v4887_v38 = vadd.f32 %v5824_v60, %v4879_v0  ;;  %5663 = vst [vmem:[#allocation2 + $0x8] sm:$0x3f] %v6632_v36  ;;  %5662 = vst [vmem:[#allocation2] sm:$0xff] %v5651_v37 }
 0x1d5   : > { %v4888_v2 = vmax.f32 %v4887_v38, 0.0 }
 0x1d7   : > { %4889 = vst [vmem:[#allocation3 + $0x23] sm:$0x7f] %v4888_v2 }
 0x1da   : > { %v5664_v39 = vld [vmem:[#allocation2] ss:$2 sm:$0x7f] }
 0x1db   : > { %v5672_v40 = vadd.f32 %v5824_v60, %v5664_v39 }
 0x1dd   : > { %v5673_v41 = vmax.f32 %v5672_v40, 0.0 }
 0x1de   : > { %v5679_v42 = vld [vmem:[#allocation3 + $0x20] sm:$0xff] }
 0x1df   : > { %5674 = vst [vmem:[#allocation3 + $0x2a] sm:$0x7f] %v5673_v41 }
 0x1e6   : > { %v5680_v43 = vld [vmem:[#allocation3 + $0x28] sm:$0xff]  ;;  %v5681_v44 = vld [vmem:[#allocation3 + $0x30] sm:$0x1] }
 0x1e7   : > { %v6111_v45 = vpack.c.bf16 %v5681_v44, %v5681_v44  ;;  %v6125_v15 = vpack.c.bf16 %v5680_v43, %v5679_v42 }
 0x1e9   : > { %6128 = vst [vmem:[%s7222_s16 + $0x10] sm:$0xff] %v6125_v15   ;;  %v5721_v46 = vsel %vm5719_vm3, %v6111_v45, %v5720_v9 }
 0x1ea   : > { %5722 = vst [vmem:[%s7222_s16 + $0x18] sm:$0x1] %v5721_v46 }
 0x1eb PF: > { %s13_s12 = sadd.s32 1, %s6760_s12  }
 0x1ec   : > { %p10_p4 = scmp.ge.s32.totalorder %s13_s12, 4  }
 0x1ee   :  { %12 = sbr.rel (!%p10_p4) target bundleno = 1 (0x1), region = 84 }

</bundles_post_ra>
